<compile_context>
chip_gen: v5e
topology: v5e:2x2
jax: 0.10.0
libtpu: 0.0.40
codegen_flags: <defaults>
</compile_context>

<pallas_src>
import jax
import jax.numpy as jnp
from jax.experimental import pallas as pl
from jax.experimental.pallas import tpu as pltpu


def _round_up(x, m):
    return (x + m - 1) // m * m


def _fused_head_kernel(x_ref, w1_ref, b1_ref, w2_ref, b2_ref, o_ref):
    # x:  (TILE_N, C_in)            f32  (cast to bf16 here, hidden under MXU)
    # w1: (C_in, 2*hidden)          bf16 (BN scale folded in)
    # b1: (1, 2*hidden)             f32  (folded BN shift)
    # w2: (2*hidden, C_out_pad)     bf16 (block-diagonal [cls | reg], zero-padded lanes)
    # b2: (1, C_out_pad)            f32
    # o:  (TILE_N, C_out_pad)       bf16 (lane-dense)
    x = x_ref[...].astype(w1_ref.dtype)
    h = jnp.dot(x, w1_ref[...], preferred_element_type=jnp.float32)
    h = jnp.maximum(h + b1_ref[...], 0.0)            # folded BN shift + ReLU
    h = h.astype(w2_ref.dtype)
    out = jnp.dot(h, w2_ref[...], preferred_element_type=jnp.float32)
    o_ref[...] = (out + b2_ref[...]).astype(o_ref.dtype)


def _choose_tile_n(R, max_tile=8192):
    """Biggest comfortable row tile; >=2 grid steps for large R (v7x megacore)."""
    if R >= 2048:
        tile = _round_up(pl.cdiv(R, 2), 512)
    else:
        tile = _round_up(R, 128)
    return min(tile, max_tile)


def _run_fused_head(x2d, w1, b1, w2, b2):
    """x2d: (R, C_in) fp32 -> (R, C_out_pad) bf16, both heads in one kernel."""
    R, C_in = x2d.shape
    hidden2 = w1.shape[1]
    C_out_pad = w2.shape[1]

    tile_n = _choose_tile_n(R)
    grid = (pl.cdiv(R, tile_n),)

    cost = pl.CostEstimate(
        flops=2 * R * (C_in * hidden2 + hidden2 * C_out_pad),
        transcendentals=0,
        bytes_accessed=(R * (4 * C_in + 2 * C_out_pad)
                        + 2 * (C_in * hidden2 + hidden2 * C_out_pad)
                        + 4 * (hidden2 + C_out_pad)),
    )

    out = pl.pallas_call(
        _fused_head_kernel,
        out_shape=jax.ShapeDtypeStruct((R, C_out_pad), jnp.bfloat16),
        grid_spec=pl.GridSpec(
            grid=grid,
            in_specs=[
                pl.BlockSpec((tile_n, C_in), lambda i: (i, 0)),       # x tile
                pl.BlockSpec((C_in, hidden2), lambda i: (0, 0)),      # W1 (resident)
                pl.BlockSpec((1, hidden2), lambda i: (0, 0)),         # folded BN shift
                pl.BlockSpec((hidden2, C_out_pad), lambda i: (0, 0)),  # W2 block-diag (resident)
                pl.BlockSpec((1, C_out_pad), lambda i: (0, 0)),       # b2
            ],
            out_specs=pl.BlockSpec((tile_n, C_out_pad), lambda i: (i, 0)),
        ),
        compiler_params=pltpu.CompilerParams(
            dimension_semantics=("parallel",),
            vmem_limit_bytes=32 * 1024 * 1024,
        ),
        cost_estimate=cost,
    )(x2d, w1, b1, w2, b2)
    return out


class BoxRegressionHeadPallas:
    """JAX/Pallas re-implementation of BoxRegressionHead.forward (eval mode)."""

    HIDDEN = 128

    def __init__(self, key, pre_channel, pred_cls_channel, pred_reg_base_num,
                 pred_reg_channel_num, angle_cls_num,
                 param_dtype=jnp.float32, compute_dtype=jnp.bfloat16):
        self.pred_cls_channel = pred_cls_channel
        self.pred_reg_base_num = pred_reg_base_num
        self.pred_reg_channel_num = pred_reg_channel_num
        self.angle_cls_num = angle_cls_num
        self.compute_dtype = compute_dtype
        hidden = self.HIDDEN
        reg_channel = pred_reg_base_num * (pred_reg_channel_num + angle_cls_num * 2)
        self.reg_channel = reg_channel
        self.c_out_total = pred_cls_channel + reg_channel
        self.c_out_pad = _round_up(self.c_out_total, 128)

        ks = jax.random.split(key, 8)

        def init(k, shape, scale=0.05):
            return (scale * jax.random.normal(k, shape)).astype(param_dtype)

        # cls branch: Conv1d(pre_channel,128,bn=True) -> Conv1d(128,cls,bn=False,act=None)
        self.cls_w1 = init(ks[0], (pre_channel, hidden))
        self.cls_s1 = 1.0 + init(ks[1], (1, hidden))   # folded BN scale (eval mode)
        self.cls_b1 = init(ks[2], (1, hidden))         # folded BN shift
        self.cls_w2 = init(ks[3], (hidden, pred_cls_channel))
        self.cls_b2 = jnp.zeros((1, pred_cls_channel), param_dtype)

        # reg branch: Conv1d(pre_channel,128,bn=True) -> Conv1d(128,reg_channel,...)
        self.reg_w1 = init(ks[4], (pre_channel, hidden))
        self.reg_s1 = 1.0 + init(ks[5], (1, hidden))
        self.reg_b1 = init(ks[6], (1, hidden))
        self.reg_w2 = init(ks[7], (hidden, reg_channel))
        self.reg_b2 = jnp.zeros((1, reg_channel), param_dtype)

        # ---- Fused / folded parameters actually fed to the kernel ----
        # BN scale folded into W1 columns; both heads concatenated along hidden.
        w1_cat = jnp.concatenate(
            [self.cls_w1 * self.cls_s1, self.reg_w1 * self.reg_s1], axis=1)
        b1_cat = jnp.concatenate([self.cls_b1, self.reg_b1], axis=1)
        # Block-diagonal second layer, zero-padded to a lane-dense column count.
        w2_bd = jnp.zeros((2 * hidden, self.c_out_pad), param_dtype)
        w2_bd = w2_bd.at[:hidden, :pred_cls_channel].set(self.cls_w2)
        w2_bd = w2_bd.at[hidden:, pred_cls_channel:self.c_out_total].set(self.reg_w2)
        b2_pad = jnp.zeros((1, self.c_out_pad), param_dtype)
        b2_pad = b2_pad.at[:, :pred_cls_channel].set(self.cls_b2)
        b2_pad = b2_pad.at[:, pred_cls_channel:self.c_out_total].set(self.reg_b2)

        self.w1_cat = w1_cat.astype(compute_dtype)
        self.b1_cat = b1_cat.astype(jnp.float32)
        self.w2_pad = w2_bd.astype(compute_dtype)
        self.b2_pad = b2_pad.astype(jnp.float32)

    def __call__(self, feature_input, output_dict):
        bs, points_num, c = feature_input.shape
        # fp32 straight into the kernel; the bf16 cast happens in-kernel.
        x2d = feature_input.reshape(bs * points_num, c)

        fused = _run_fused_head(x2d, self.w1_cat, self.b1_cat,
                                self.w2_pad, self.b2_pad)
        fused = fused[:, :self.c_out_total].astype(jnp.float32)

        pred_cls = fused[:, :self.pred_cls_channel].reshape(
            bs, points_num, self.pred_cls_channel)
        per_base = self.pred_reg_channel_num + self.angle_cls_num * 2
        pred_reg = fused[:, self.pred_cls_channel:].reshape(
            bs, points_num, self.pred_reg_base_num, per_base)

        c0 = self.pred_reg_channel_num
        c1 = c0 + self.angle_cls_num
        output_dict.setdefault("pred_cls", []).append(pred_cls)
        output_dict.setdefault("pred_offset", []).append(pred_reg[:, :, :, 0:c0])
        output_dict.setdefault("pred_angle_cls", []).append(pred_reg[:, :, :, c0:c1])
        output_dict.setdefault("pred_angle_res", []).append(pred_reg[:, :, :, c1:])
        return output_dict


# ---------------------------------------------------------------------------
# References for the self-test.
# ---------------------------------------------------------------------------
def _reference_fp32(head, feature_input):
    """Full-fp32 reference of the module math (folded eval-mode BN)."""
    hi = jax.lax.Precision.HIGHEST

    def mlp(x, w1, s1, b1, w2, b2):
        h = jnp.maximum(jnp.dot(x, w1, precision=hi) * s1 + b1, 0.0)
        return jnp.dot(h, w2, precision=hi) + b2

    bs, n, c = feature_input.shape
    x2d = feature_input.reshape(bs * n, c)
    cls = mlp(x2d, head.cls_w1, head.cls_s1, head.cls_b1, head.cls_w2, head.cls_b2)
    reg = mlp(x2d, head.reg_w1, head.reg_s1, head.reg_b1, head.reg_w2, head.reg_b2)
    return cls.reshape(bs, n, -1), reg.reshape(bs, n, head.pred_reg_base_num, -1)


def _reference_bf16(head, feature_input):
    """Reference mimicking the kernel's bf16 operands / fp32 accumulate / bf16 out."""
    hi = jax.lax.Precision.HIGHEST
    bs, n, c = feature_input.shape
    x = feature_input.reshape(bs * n, c).astype(jnp.bfloat16).astype(jnp.float32)
    w1 = head.w1_cat.astype(jnp.float32)
    w2 = head.w2_pad.astype(jnp.float32)
    h = jnp.maximum(jnp.dot(x, w1, precision=hi) + head.b1_cat, 0.0)
    h = h.astype(jnp.bfloat16).astype(jnp.float32)
    out = jnp.dot(h, w2, precision=hi) + head.b2_pad
    out = out.astype(jnp.bfloat16).astype(jnp.float32)   # kernel stores bf16
    out = out[:, :head.c_out_total]
    cls = out[:, :head.pred_cls_channel]
    reg = out[:, head.pred_cls_channel:]
    return (cls.reshape(bs, n, -1),
            reg.reshape(bs, n, head.pred_reg_base_num, -1))


if __name__ == "__main__":
    key = jax.random.PRNGKey(0)
    kx, kp = jax.random.split(key)

    # Small shapes consistent with the module's forward.
    bs, points_num, pre_channel = 2, 256, 32
    pred_cls_channel = 4
    pred_reg_base_num = 1
    pred_reg_channel_num = 6
    angle_cls_num = 12   # cfg.MODEL.ANGLE_CLS_NUM

    feature_input = jax.random.normal(kx, (bs, points_num, pre_channel),
                                      dtype=jnp.float32)

    head = BoxRegressionHeadPallas(
        kp, pre_channel, pred_cls_channel, pred_reg_base_num,
        pred_reg_channel_num, angle_cls_num)

    output_dict = {}
    output_dict = head(feature_input, output_dict)
    jax.block_until_ready(output_dict)

    # Shape checks (match PyTorch module semantics).
    assert output_dict["pred_cls"][0].shape == (bs, points_num, pred_cls_channel)
    assert output_dict["pred_offset"][0].shape == (
        bs, points_num, pred_reg_base_num, pred_reg_channel_num)
    assert output_dict["pred_angle_cls"][0].shape == (
        bs, points_num, pred_reg_base_num, angle_cls_num)
    assert output_dict["pred_angle_res"][0].shape == (
        bs, points_num, pred_reg_base_num, angle_cls_num)

    c0 = pred_reg_channel_num
    c1 = c0 + angle_cls_num

    # Tight check: same bf16-quantized operands and bf16 output rounding as the
    # kernel; only MXU-vs-host fp32 accumulation order differs.
    tcls, treg = _reference_bf16(head, feature_input)
    assert jnp.allclose(output_dict["pred_cls"][0], tcls, atol=4e-3)
    assert jnp.allclose(output_dict["pred_offset"][0], treg[..., :c0], atol=4e-3)
    assert jnp.allclose(output_dict["pred_angle_cls"][0], treg[..., c0:c1], atol=4e-3)
    assert jnp.allclose(output_dict["pred_angle_res"][0], treg[..., c1:], atol=4e-3)

    # Loose check against the full-fp32 module math (bounded bf16 error).
    rcls, rreg = _reference_fp32(head, feature_input)
    assert jnp.allclose(output_dict["pred_cls"][0], rcls, atol=3e-2)
    assert jnp.allclose(output_dict["pred_offset"][0], rreg[..., :c0], atol=3e-2)
    assert jnp.allclose(output_dict["pred_angle_cls"][0], rreg[..., c0:c1], atol=3e-2)
    assert jnp.allclose(output_dict["pred_angle_res"][0], rreg[..., c1:], atol=3e-2)

    print("KERNEL_OK")
</pallas_src>

<mosaic_0001>
module attributes {stable_mosaic.version = 11 : i64} {
  func.func @_fused_head_kernel(%arg0: i32, %arg1: memref<512x32xf32, #tpu.memory_space<vmem>>, %arg2: memref<32x256xbf16, #tpu.memory_space<vmem>>, %arg3: memref<1x256xf32, #tpu.memory_space<vmem>>, %arg4: memref<256x128xbf16, #tpu.memory_space<vmem>>, %arg5: memref<1x128xf32, #tpu.memory_space<vmem>>, %arg6: memref<512x128xbf16, #tpu.memory_space<vmem>>) attributes {dimension_semantics = [#tpu.dimension_semantics<parallel>], iteration_bounds = array<i64: 1>, scalar_prefetch = 0 : i64, scratch_operands = 0 : i64, tpu.core_type = #tpu.core_type<tc>, window_params = [{transform_indices = @transform_0, window_bounds = array<i64: 512, 32>}, {pipeline_mode = #tpu.pipeline_mode<synchronous>, transform_indices = @transform_1, window_bounds = array<i64: 32, 256>}, {pipeline_mode = #tpu.pipeline_mode<synchronous>, transform_indices = @transform_2, window_bounds = array<i64: 1, 256>}, {pipeline_mode = #tpu.pipeline_mode<synchronous>, transform_indices = @transform_3, window_bounds = array<i64: 256, 128>}, {pipeline_mode = #tpu.pipeline_mode<synchronous>, transform_indices = @transform_4, window_bounds = array<i64: 1, 128>}, {transform_indices = @transform_5, window_bounds = array<i64: 512, 128>}]} {
    %c0 = arith.constant 0 : index
    %c0_0 = arith.constant 0 : index
    %0 = vector.load %arg1[%c0, %c0_0] : memref<512x32xf32, #tpu.memory_space<vmem>>, vector<512x32xf32>
    %1 = arith.truncf %0 : vector<512x32xf32> to vector<512x32xbf16>
    %c0_1 = arith.constant 0 : index
    %c0_2 = arith.constant 0 : index
    %2 = vector.load %arg2[%c0_1, %c0_2] : memref<32x256xbf16, #tpu.memory_space<vmem>>, vector<32x256xbf16>
    %cst = arith.constant dense<0.000000e+00> : vector<512x256xf32>
    %3 = tpu.matmul %1, %2, %cst {dimension_numbers = #tpu.dot_dimension_numbers<[1], [0], [0], [1], [0, 0, 1, 1], [], []>} : vector<512x32xbf16>, vector<32x256xbf16>, vector<512x256xf32> -> vector<512x256xf32>
    %c0_3 = arith.constant 0 : index
    %c0_4 = arith.constant 0 : index
    %4 = vector.load %arg3[%c0_3, %c0_4] : memref<1x256xf32, #tpu.memory_space<vmem>>, vector<1x256xf32>
    %5 = vector.broadcast %4 : vector<1x256xf32> to vector<512x256xf32>
    %6 = arith.addf %3, %5 : vector<512x256xf32>
    %cst_5 = arith.constant 0.000000e+00 : f32
    %7 = vector.broadcast %cst_5 : f32 to vector<512x256xf32>
    %8 = arith.maximumf %6, %7 : vector<512x256xf32>
    %9 = arith.truncf %8 : vector<512x256xf32> to vector<512x256xbf16>
    %c0_6 = arith.constant 0 : index
    %c0_7 = arith.constant 0 : index
    %10 = vector.load %arg4[%c0_6, %c0_7] : memref<256x128xbf16, #tpu.memory_space<vmem>>, vector<256x128xbf16>
    %cst_8 = arith.constant dense<0.000000e+00> : vector<512x128xf32>
    %11 = tpu.matmul %9, %10, %cst_8 {dimension_numbers = #tpu.dot_dimension_numbers<[1], [0], [0], [1], [0, 0, 1, 1], [], []>} : vector<512x256xbf16>, vector<256x128xbf16>, vector<512x128xf32> -> vector<512x128xf32>
    %c0_9 = arith.constant 0 : index
    %c0_10 = arith.constant 0 : index
    %12 = vector.load %arg5[%c0_9, %c0_10] : memref<1x128xf32, #tpu.memory_space<vmem>>, vector<1x128xf32>
    %13 = vector.broadcast %12 : vector<1x128xf32> to vector<512x128xf32>
    %14 = arith.addf %11, %13 : vector<512x128xf32>
    %15 = arith.truncf %14 : vector<512x128xf32> to vector<512x128xbf16>
    %c0_11 = arith.constant 0 : index
    %c0_12 = arith.constant 0 : index
    %16 = vector.load %arg6[%c0_11, %c0_12] : memref<512x128xbf16, #tpu.memory_space<vmem>>, vector<512x128xbf16>
    tpu.vector_store %arg6[%c0_11, %c0_12], %15 {strides = array<i32>} : memref<512x128xbf16, #tpu.memory_space<vmem>>, vector<512x128xbf16>,
    return
  }
  func.func @transform_0(%arg0: i32) -> (i32, i32) {
    %c0_i32 = arith.constant 0 : i32
    %c0_i32_0 = arith.constant 0 : i32
    return %arg0, %c0_i32 : i32, i32
  }
  func.func @transform_1(%arg0: i32) -> (i32, i32) {
    %c0_i32 = arith.constant 0 : i32
    %c0_i32_0 = arith.constant 0 : i32
    %c0_i32_1 = arith.constant 0 : i32
    return %c0_i32, %c0_i32_0 : i32, i32
  }
  func.func @transform_2(%arg0: i32) -> (i32, i32) {
    %c0_i32 = arith.constant 0 : i32
    %c0_i32_0 = arith.constant 0 : i32
    %c0_i32_1 = arith.constant 0 : i32
    return %c0_i32, %c0_i32_0 : i32, i32
  }
  func.func @transform_3(%arg0: i32) -> (i32, i32) {
    %c0_i32 = arith.constant 0 : i32
    %c0_i32_0 = arith.constant 0 : i32
    %c0_i32_1 = arith.constant 0 : i32
    return %c0_i32, %c0_i32_0 : i32, i32
  }
  func.func @transform_4(%arg0: i32) -> (i32, i32) {
    %c0_i32 = arith.constant 0 : i32
    %c0_i32_0 = arith.constant 0 : i32
    %c0_i32_1 = arith.constant 0 : i32
    return %c0_i32, %c0_i32_0 : i32, i32
  }
  func.func @transform_5(%arg0: i32) -> (i32, i32) {
    %c0_i32 = arith.constant 0 : i32
    %c0_i32_0 = arith.constant 0 : i32
    return %arg0, %c0_i32 : i32, i32
  }
}

</mosaic_0001>

<bundles_post_ra>
// kernel: tpu_custom_call.1
= control target key start
LH: loop header
LB: loop body
LE: loop exit
PB: predicated region body
PF: predicated region fallthrough
CT: control target
= control target key end

     0   :  { %s2350_s0 = inlined_call_operand.vmem [shape: f32[512,32], index: 0, kind: input, shape index: {}]   ;;  %s2351_s1 = inlined_call_operand.vmem [shape: bf16[32,256], index: 1, kind: input, shape index: {}]   ;;  %s2352_s2 = inlined_call_operand.vmem [shape: f32[1,256], index: 2, kind: input, shape index: {}]   ;;  %s2353_s3 = inlined_call_operand.vmem [shape: bf16[256,128], index: 3, kind: input, shape index: {}]   ;;  %s2354_s4 = inlined_call_operand.vmem [shape: f32[1,128], index: 4, kind: input, shape index: {}]   ;;  %s2355_s5 = inlined_call_operand.hbm [shape: bf16[512,128], index: 5, kind: output, shape index: {}]  }
   0x1   :  { %v1401_v0 = vld [vmem:[%s2351_s1 + $0x10] sm:$0xf]  ;;  %v1538_v1 = vld [vmem:[%s2351_s1 + $0x14] sm:$0xf0]  ;;  %v1537_v2 = vld [vmem:[%s2351_s1 + $0x14] sm:$0xf] }
   0x2   :  { %v1402_v3 = vor.u32 %v1538_v1, %v1401_v0  ;;  %v1403_v4 = vld [vmem:[%s2351_s1 + $0x18] sm:$0xf0]  ;;  %v1393_v5 = vld [vmem:[%s2351_s1] sm:$0xf]  ;;  %v1536_v6 = vld [vmem:[%s2351_s1 + $0x4] sm:$0xf0] }
   0x3   :  { %v1406_v7 = vor.u32 %v1537_v2, %v1403_v4  ;;  %v1535_v8 = vld [vmem:[%s2351_s1 + $0x4] sm:$0xf]  ;;  %v1395_v9 = vld [vmem:[%s2351_s1 + $0x8] sm:$0xf0]  ;;  %v1394_v10 = vor.u32 %v1536_v6, %v1393_v5 }
   0x4   :  { %251 = vmatpush.bf16.msra.mxu0 %v1402_v3  ;;  %v22_v11 = vld [vmem:[%s2350_s0] sm:$0xff]  ;;  %v23_v12 = vld [vmem:[%s2350_s0 + $0x8] sm:$0xff]  ;;  %v1398_v13 = vor.u32 %v1535_v8, %v1395_v9 }
   0x5   :  { %420 = vmatpush.bf16.msra.mxu1 %v1406_v7 }
   0x6   :  { %10 = vsyncpa [#allocation3], 0  ;;  %v86_v14 = vpack.c.bf16 %v23_v12, %v22_v11  ;;  %vm148_vm0 = vcmask 261120   ;;  %v24_v15 = vld [vmem:[%s2350_s0 + $0x10] sm:$0xff]  ;;  %v25_v16 = vld [vmem:[%s2350_s0 + $0x18] sm:$0xff]  ;;  %s1379_s1 = sshll.u32 %s2355_s5, 4  ;;  %s1380_s1 = int_to_ptr.hbm [resolvable:$true] %s1379_s1 }
   0x7   :  { %v87_v17 = vpack.c.bf16 %v25_v16, %v24_v15  ;;  %v26_v18 = vld [vmem:[%s2350_s0 + $0x20] sm:$0xff]  ;;  %v27_v19 = vld [vmem:[%s2350_s0 + $0x28] sm:$0xff]  ;;  %v28_v21 = vld [vmem:[%s2350_s0 + $0x30] sm:$0xff]  ;;  %s1778_s13 = smov 64   ;;  %s1779_s14 = smov 4  }
   0x8   :  { %252 = vmatpush.bf16.msra.mxu0 %v1394_v10  ;;  %v88_v20 = vpack.c.bf16 %v27_v19, %v26_v18  ;;  %v29_v22 = vld [vmem:[%s2350_s0 + $0x38] sm:$0xff]  ;;  %v30_v24 = vld [vmem:[%s2350_s0 + $0x40] sm:$0xff]  ;;  %v31_v25 = vld [vmem:[%s2350_s0 + $0x48] sm:$0xff] }
   0x9   :  { %421 = vmatpush.bf16.msra.mxu1 %v1398_v13  ;;  %v89_v23 = vpack.c.bf16 %v29_v22, %v28_v21  ;;  %v90_v26 = vpack.c.bf16 %v31_v25, %v30_v24  ;;  %v1546_v27 = vld [vmem:[%s2353_s3 + $0x38] sm:$0xff]  ;;  %v32_v29 = vld [vmem:[%s2350_s0 + $0x50] sm:$0xff]  ;;  %v1544_v34 = vld [vmem:[%s2353_s3 + $0x28] sm:$0xff] }
   0xa   :  { %v1554_v28 = vld [vmem:[%s2353_s3 + $0x78] sm:$0xff]  ;;  %907 = vmatpush.bf16.msra.mxu2 %v1546_v27  ;;  %v1545_v32 = vld [vmem:[%s2353_s3 + $0x30] sm:$0xff]  ;;  %v1552_v35 = vld [vmem:[%s2353_s3 + $0x68] sm:$0xff] }
   0xb   :  { %1407 = vmatmul.msk.bf16.vlgmr.msra.gmra.mxu0 %vm148_vm0, %v86_v14  ;;  %1076 = vmatpush.bf16.msra.mxu3 %v1554_v28  ;;  %v33_v30 = vld [vmem:[%s2350_s0 + $0x58] sm:$0xff]  ;;  %v1553_v33 = vld [vmem:[%s2353_s3 + $0x70] sm:$0xff]  ;;  %v1543_v36 = vld [vmem:[%s2353_s3 + $0x20] sm:$0xff] }
   0xc   :  { %1439 = vmatmul.msk.bf16.vlgmr.msra.gmra.mxu1 %vm148_vm0, %v86_v14  ;;  %v91_v31 = vpack.c.bf16 %v33_v30, %v32_v29  ;;  %v1551_v37 = vld [vmem:[%s2353_s3 + $0x60] sm:$0xff]  ;;  %v35_v39 = vld [vmem:[%s2350_s0 + $0x68] sm:$0xff]  ;;  %v1542_v41 = vld [vmem:[%s2353_s3 + $0x18] sm:$0xff] }
   0xd   :  { %v34_v38 = vld [vmem:[%s2350_s0 + $0x60] sm:$0xff]  ;;  %v1550_v42 = vld [vmem:[%s2353_s3 + $0x58] sm:$0xff]  ;;  %v1541_v43 = vld [vmem:[%s2353_s3 + $0x10] sm:$0xff] }
   0xe   :  { %908 = vmatpush.bf16.msra.mxu2 %v1545_v32  ;;  %v92_v40 = vpack.c.bf16 %v35_v39, %v34_v38  ;;  %v1549_v44 = vld [vmem:[%s2353_s3 + $0x50] sm:$0xff]  ;;  %v1540_v45 = vld [vmem:[%s2353_s3 + $0x8] sm:$0xff]  ;;  %v1539_v47 = vld [vmem:[%s2353_s3] sm:$0xff] }
   0xf   :  { %1077 = vmatpush.bf16.msra.mxu3 %v1553_v33  ;;  %v1548_v46 = vld [vmem:[%s2353_s3 + $0x48] sm:$0xff]  ;;  %v1547_v48 = vld [vmem:[%s2353_s3 + $0x40] sm:$0xff]  ;;  %v36_v49 = vld [vmem:[%s2350_s0 + $0x70] sm:$0xff] }
  0x10   :  { %v37_v50 = vld [vmem:[%s2350_s0 + $0x78] sm:$0xff]  ;;  %v38_v52 = vld [vmem:[%s2350_s0 + $0x80] sm:$0xff]  ;;  %v39_v53 = vld [vmem:[%s2350_s0 + $0x88] sm:$0xff] }
  0x11   :  { %v93_v51 = vpack.c.bf16 %v37_v50, %v36_v49  ;;  %v94_v54 = vpack.c.bf16 %v39_v53, %v38_v52  ;;  %v122_v55 = vld [vmem:[%s2352_s2] sm:$0x3]  ;;  %v40_v6 = vld [vmem:[%s2350_s0 + $0x90] sm:$0xff]  ;;  %v41_v7 = vld [vmem:[%s2350_s0 + $0x98] sm:$0xff] }
  0x12   :  { %909 = vmatpush.bf16.msra.mxu2 %v1544_v34  ;;  %v1955_v58 = vperm.slane %v122_v55, 0  ;;  %v1958_v59 = vperm.slane %v122_v55, 1  ;;  %v95_v10 = vpack.c.bf16 %v41_v7, %v40_v6  ;;  %v43_v24 = vld [vmem:[%s2350_s0 + $0xa8] sm:$0xff] }
  0x13   :  { %1078 = vmatpush.bf16.msra.mxu3 %v1552_v35 }
  0x16   :  { %910 = vmatpush.bf16.msra.mxu2 %v1543_v36 }
  0x17   :  { %1079 = vmatpush.bf16.msra.mxu3 %v1551_v37 }
  0x1a   :  { %911 = vmatpush.bf16.msra.mxu2 %v1542_v41  ;;  %v45_v41 = vld [vmem:[%s2350_s0 + $0xb8] sm:$0xff] }
  0x1b   :  { %1408 = vmatmul.msk.bf16.gmra.mxu0 %vm148_vm0, %v87_v17  ;;  %1080 = vmatpush.bf16.msra.mxu3 %v1550_v42 }
  0x1c   :  { %1440 = vmatmul.msk.bf16.gmra.mxu1 %vm148_vm0, %v87_v17 }
  0x1e   :  { %912 = vmatpush.bf16.msra.mxu2 %v1541_v43 }
  0x1f   :  { %1081 = vmatpush.bf16.msra.mxu3 %v1549_v44 }
  0x22   :  { %913 = vmatpush.bf16.msra.mxu2 %v1540_v45 }
  0x23   :  { %1082 = vmatpush.bf16.msra.mxu3 %v1548_v46 }
  0x26   :  { %914 = vmatpush.bf16.msra.mxu2 %v1539_v47 }
  0x27   :  { %1083 = vmatpush.bf16.msra.mxu3 %v1547_v48 }
  0x2b   :  { %1409 = vmatmul.msk.bf16.gmra.mxu0 %vm148_vm0, %v88_v20 }
  0x2c   :  { %1441 = vmatmul.msk.bf16.gmra.mxu1 %vm148_vm0, %v88_v20 }
  0x3b   :  { %1410 = vmatmul.msk.bf16.gmra.mxu0 %vm148_vm0, %v89_v23 }
  0x3c   :  { %1442 = vmatmul.msk.bf16.gmra.mxu1 %vm148_vm0, %v89_v23  ;;  %v42_v23 = vld [vmem:[%s2350_s0 + $0xa0] sm:$0xff] }
  0x3d   :  { %v96_v27 = vpack.c.bf16 %v43_v24, %v42_v23 }
  0x4b   :  { %1411 = vmatmul.msk.bf16.gmra.mxu0 %vm148_vm0, %v90_v26 }
  0x4c   :  { %1443 = vmatmul.msk.bf16.gmra.mxu1 %vm148_vm0, %v90_v26 }
  0x5b   :  { %1412 = vmatmul.msk.bf16.gmra.mxu0 %vm148_vm0, %v91_v31 }
  0x5c   :  { %1444 = vmatmul.msk.bf16.gmra.mxu1 %vm148_vm0, %v91_v31 }
  0x6b   :  { %1413 = vmatmul.msk.bf16.gmra.mxu0 %vm148_vm0, %v92_v40 }
  0x6c   :  { %1445 = vmatmul.msk.bf16.gmra.mxu1 %vm148_vm0, %v92_v40  ;;  %v44_v40 = vld [vmem:[%s2350_s0 + $0xb0] sm:$0xff] }
  0x6d   :  { %v97_v44 = vpack.c.bf16 %v45_v41, %v44_v40 }
  0x7b   :  { %1414 = vmatmul.msk.bf16.gmra.mxu0 %vm148_vm0, %v93_v51 }
  0x7c   :  { %1446 = vmatmul.msk.bf16.gmra.mxu1 %vm148_vm0, %v93_v51 }
  0x88   :  { %v254_v56 = vpop.f32.mrf.mxu0 }
  0x89   :  { %v423_v57 = vpop.f32.mrf.mxu1  ;;  %v255_v60 = vadd.f32 %v254_v56, %v1955_v58 }
  0x8a   :  { %v424_v61 = vadd.f32 %v423_v57, %v1958_v59  ;;  %v46_v57 = vld [vmem:[%s2350_s0 + $0xc0] sm:$0xff] }
  0x8b   :  { %1415 = vmatmul.msk.bf16.gmra.mxu0 %vm148_vm0, %v94_v54  ;;  %v583_v2 = vmax.f32 %v255_v60, 0.0  ;;  %v47_v60 = vld [vmem:[%s2350_s0 + $0xc8] sm:$0xff] }
  0x8c   :  { %1447 = vmatmul.msk.bf16.gmra.mxu1 %vm148_vm0, %v94_v54  ;;  %v584_v4 = vmax.f32 %v424_v61, 0.0 }
  0x90   :  { %v256_v62 = vpop.f32.mrf.mxu0 }
  0x91   :  { %v257_v63 = vadd.f32 %v256_v62, %v1955_v58  ;;  %v425_v0 = vpop.f32.mrf.mxu1 }
  0x92   :  { %v426_v1 = vadd.f32 %v425_v0, %v1958_v59 }
  0x93   :  { %v585_v3 = vmax.f32 %v257_v63, 0.0  ;;  %v98_v63 = vpack.c.bf16 %v47_v60, %v46_v57 }
  0x94   :  { %v586_v5 = vmax.f32 %v426_v1, 0.0 }
  0x95   :  { %v711_v8 = vpack.c.bf16 %v585_v3, %v583_v2 }
  0x96   :  { %v712_v9 = vpack.c.bf16 %v586_v5, %v584_v4 }
  0x97   :  { %915 = vmatmul.bf16.vlgmr.msra.gmra.mxu2 %v711_v8 }
  0x98   :  { %1084 = vmatmul.bf16.vlgmr.msra.gmra.mxu3 %v712_v9  ;;  %v259_v11 = vpop.f32.mrf.mxu0 }
  0x99   :  { %v428_v12 = vpop.f32.mrf.mxu1  ;;  %v260_v13 = vadd.f32 %v259_v11, %v1955_v58 }
  0x9a   :  { %v429_v14 = vadd.f32 %v428_v12, %v1958_v59  ;;  %v48_v12 = vld [vmem:[%s2350_s0 + $0xd0] sm:$0xff] }
  0x9b   :  { %1416 = vmatmul.msk.bf16.gmra.mxu0 %vm148_vm0, %v95_v10  ;;  %v587_v19 = vmax.f32 %v260_v13, 0.0  ;;  %v49_v13 = vld [vmem:[%s2350_s0 + $0xd8] sm:$0xff] }
  0x9c   :  { %1448 = vmatmul.msk.bf16.gmra.mxu1 %vm148_vm0, %v95_v10  ;;  %v588_v21 = vmax.f32 %v429_v14, 0.0 }
  0xa0   :  { %v261_v15 = vpop.f32.mrf.mxu0 }
  0xa1   :  { %v262_v16 = vadd.f32 %v261_v15, %v1955_v58  ;;  %v430_v17 = vpop.f32.mrf.mxu1 }
  0xa2   :  { %v431_v18 = vadd.f32 %v430_v17, %v1958_v59 }
  0xa3   :  { %v589_v20 = vmax.f32 %v262_v16, 0.0  ;;  %v99_v16 = vpack.c.bf16 %v49_v13, %v48_v12 }
  0xa4   :  { %v590_v22 = vmax.f32 %v431_v18, 0.0 }
  0xa5   :  { %v713_v25 = vpack.c.bf16 %v589_v20, %v587_v19 }
  0xa6   :  { %v714_v26 = vpack.c.bf16 %v590_v22, %v588_v21 }
  0xa7   :  { %920 = vmatmul.bf16.gmra.mxu2 %v713_v25 }
  0xa8   :  { %1089 = vmatmul.bf16.gmra.mxu3 %v714_v26  ;;  %v264_v28 = vpop.f32.mrf.mxu0 }
  0xa9   :  { %v433_v29 = vpop.f32.mrf.mxu1  ;;  %v265_v30 = vadd.f32 %v264_v28, %v1955_v58 }
  0xaa   :  { %v434_v31 = vadd.f32 %v433_v29, %v1958_v59  ;;  %v50_v29 = vld [vmem:[%s2350_s0 + $0xe0] sm:$0xff] }
  0xab   :  { %1417 = vmatmul.msk.bf16.gmra.mxu0 %vm148_vm0, %v96_v27  ;;  %v591_v36 = vmax.f32 %v265_v30, 0.0  ;;  %v51_v30 = vld [vmem:[%s2350_s0 + $0xe8] sm:$0xff] }
  0xac   :  { %1449 = vmatmul.msk.bf16.gmra.mxu1 %vm148_vm0, %v96_v27  ;;  %v592_v38 = vmax.f32 %v434_v31, 0.0 }
  0xb0   :  { %v266_v32 = vpop.f32.mrf.mxu0 }
  0xb1   :  { %v267_v33 = vadd.f32 %v266_v32, %v1955_v58  ;;  %v435_v34 = vpop.f32.mrf.mxu1 }
  0xb2   :  { %v436_v35 = vadd.f32 %v435_v34, %v1958_v59 }
  0xb3   :  { %v593_v37 = vmax.f32 %v267_v33, 0.0  ;;  %v100_v33 = vpack.c.bf16 %v51_v30, %v50_v29 }
  0xb4   :  { %v594_v39 = vmax.f32 %v436_v35, 0.0 }
  0xb5   :  { %v715_v42 = vpack.c.bf16 %v593_v37, %v591_v36 }
  0xb6   :  { %v716_v43 = vpack.c.bf16 %v594_v39, %v592_v38 }
  0xb7   :  { %925 = vmatmul.bf16.gmra.mxu2 %v715_v42 }
  0xb8   :  { %1094 = vmatmul.bf16.gmra.mxu3 %v716_v43  ;;  %v269_v45 = vpop.f32.mrf.mxu0 }
  0xb9   :  { %v438_v46 = vpop.f32.mrf.mxu1  ;;  %v270_v47 = vadd.f32 %v269_v45, %v1955_v58 }
  0xba   :  { %v439_v48 = vadd.f32 %v438_v46, %v1958_v59  ;;  %v52_v46 = vld [vmem:[%s2350_s0 + $0xf0] sm:$0xff] }
  0xbb   :  { %1418 = vmatmul.msk.bf16.gmra.mxu0 %vm148_vm0, %v97_v44  ;;  %v595_v53 = vmax.f32 %v270_v47, 0.0  ;;  %v53_v47 = vld [vmem:[%s2350_s0 + $0xf8] sm:$0xff] }
  0xbc   :  { %1450 = vmatmul.msk.bf16.gmra.mxu1 %vm148_vm0, %v97_v44  ;;  %v596_v55 = vmax.f32 %v439_v48, 0.0 }
  0xc0   :  { %v271_v49 = vpop.f32.mrf.mxu0 }
  0xc1   :  { %v272_v50 = vadd.f32 %v271_v49, %v1955_v58  ;;  %v440_v51 = vpop.f32.mrf.mxu1 }
  0xc2   :  { %v441_v52 = vadd.f32 %v440_v51, %v1958_v59 }
  0xc3   :  { %v597_v54 = vmax.f32 %v272_v50, 0.0  ;;  %v101_v50 = vpack.c.bf16 %v53_v47, %v52_v46 }
  0xc4   :  { %v598_v56 = vmax.f32 %v441_v52, 0.0 }
  0xc5   :  { %v717_v61 = vpack.c.bf16 %v597_v54, %v595_v53 }
  0xc6   :  { %v718_v62 = vpack.c.bf16 %v598_v56, %v596_v55 }
  0xc7   :  { %930 = vmatmul.bf16.gmra.mxu2 %v717_v61 }
  0xc8   :  { %1099 = vmatmul.bf16.gmra.mxu3 %v718_v62  ;;  %v274_v0 = vpop.f32.mrf.mxu0 }
  0xc9   :  { %v443_v1 = vpop.f32.mrf.mxu1  ;;  %v275_v2 = vadd.f32 %v274_v0, %v1955_v58 }
  0xca   :  { %v444_v3 = vadd.f32 %v443_v1, %v1958_v59  ;;  %v54_v1 = vld [vmem:[%s2350_s0 + $0x100] sm:$0xff] }
  0xcb   :  { %1419 = vmatmul.msk.bf16.gmra.mxu0 %vm148_vm0, %v98_v63  ;;  %v599_v8 = vmax.f32 %v275_v2, 0.0  ;;  %v55_v2 = vld [vmem:[%s2350_s0 + $0x108] sm:$0xff] }
  0xcc   :  { %1451 = vmatmul.msk.bf16.gmra.mxu1 %vm148_vm0, %v98_v63  ;;  %v600_v10 = vmax.f32 %v444_v3, 0.0 }
  0xd0   :  { %v276_v4 = vpop.f32.mrf.mxu0 }
  0xd1   :  { %v277_v5 = vadd.f32 %v276_v4, %v1955_v58  ;;  %v445_v6 = vpop.f32.mrf.mxu1 }
  0xd2   :  { %v446_v7 = vadd.f32 %v445_v6, %v1958_v59 }
  0xd3   :  { %v601_v9 = vmax.f32 %v277_v5, 0.0  ;;  %v102_v5 = vpack.c.bf16 %v55_v2, %v54_v1 }
  0xd4   :  { %v602_v11 = vmax.f32 %v446_v7, 0.0 }
  0xd5   :  { %v719_v14 = vpack.c.bf16 %v601_v9, %v599_v8 }
  0xd6   :  { %v720_v15 = vpack.c.bf16 %v602_v11, %v600_v10 }
  0xd7   :  { %935 = vmatmul.bf16.gmra.mxu2 %v719_v14 }
  0xd8   :  { %1104 = vmatmul.bf16.gmra.mxu3 %v720_v15  ;;  %v279_v17 = vpop.f32.mrf.mxu0 }
  0xd9   :  { %v448_v18 = vpop.f32.mrf.mxu1  ;;  %v280_v19 = vadd.f32 %v279_v17, %v1955_v58 }
  0xda   :  { %v449_v20 = vadd.f32 %v448_v18, %v1958_v59  ;;  %v56_v18 = vld [vmem:[%s2350_s0 + $0x110] sm:$0xff] }
  0xdb   :  { %1420 = vmatmul.msk.bf16.gmra.mxu0 %vm148_vm0, %v99_v16  ;;  %v603_v25 = vmax.f32 %v280_v19, 0.0  ;;  %v57_v19 = vld [vmem:[%s2350_s0 + $0x118] sm:$0xff] }
  0xdc   :  { %1452 = vmatmul.msk.bf16.gmra.mxu1 %vm148_vm0, %v99_v16  ;;  %v604_v27 = vmax.f32 %v449_v20, 0.0 }
  0xe0   :  { %v281_v21 = vpop.f32.mrf.mxu0 }
  0xe1   :  { %v282_v22 = vadd.f32 %v281_v21, %v1955_v58  ;;  %v450_v23 = vpop.f32.mrf.mxu1 }
  0xe2   :  { %v451_v24 = vadd.f32 %v450_v23, %v1958_v59 }
  0xe3   :  { %v605_v26 = vmax.f32 %v282_v22, 0.0  ;;  %v103_v22 = vpack.c.bf16 %v57_v19, %v56_v18 }
  0xe4   :  { %v606_v28 = vmax.f32 %v451_v24, 0.0 }
  0xe5   :  { %v721_v31 = vpack.c.bf16 %v605_v26, %v603_v25 }
  0xe6   :  { %v722_v32 = vpack.c.bf16 %v606_v28, %v604_v27  ;;  %v2072_v27 = vld [vmem:[%s2354_s4] ss:$0 sm:$0xff] }
  0xe7   :  { %940 = vmatmul.bf16.gmra.mxu2 %v721_v31 }
  0xe8   :  { %1109 = vmatmul.bf16.gmra.mxu3 %v722_v32  ;;  %v284_v34 = vpop.f32.mrf.mxu0 }
  0xe9   :  { %v453_v35 = vpop.f32.mrf.mxu1  ;;  %v285_v36 = vadd.f32 %v284_v34, %v1955_v58 }
  0xea   :  { %v454_v37 = vadd.f32 %v453_v35, %v1958_v59 }
  0xeb   :  { %1421 = vmatmul.msk.bf16.gmra.mxu0 %vm148_vm0, %v100_v33  ;;  %v607_v42 = vmax.f32 %v285_v36, 0.0 }
  0xec   :  { %1453 = vmatmul.msk.bf16.gmra.mxu1 %vm148_vm0, %v100_v33  ;;  %v608_v44 = vmax.f32 %v454_v37, 0.0 }
  0xf0   :  { %v286_v38 = vpop.f32.mrf.mxu0 }
  0xf1   :  { %v287_v39 = vadd.f32 %v286_v38, %v1955_v58  ;;  %v455_v40 = vpop.f32.mrf.mxu1 }
  0xf2   :  { %v456_v41 = vadd.f32 %v455_v40, %v1958_v59 }
  0xf3   :  { %v609_v43 = vmax.f32 %v287_v39, 0.0 }
  0xf4   :  { %v610_v45 = vmax.f32 %v456_v41, 0.0 }
  0xf5   :  { %v723_v48 = vpack.c.bf16 %v609_v43, %v607_v42  ;;  %v58_v42 = vld [vmem:[%s2350_s0 + $0x120] sm:$0xff]  ;;  %v59_v43 = vld [vmem:[%s2350_s0 + $0x128] sm:$0xff] }
  0xf6   :  { %v724_v49 = vpack.c.bf16 %v610_v45, %v608_v44 }
  0xf7   :  { %945 = vmatmul.bf16.gmra.mxu2 %v723_v48 }
  0xf8   :  { %1114 = vmatmul.bf16.gmra.mxu3 %v724_v49  ;;  %v289_v51 = vpop.f32.mrf.mxu0  ;;  %v104_v49 = vpack.c.bf16 %v59_v43, %v58_v42 }
  0xf9   :  { %v458_v52 = vpop.f32.mrf.mxu1  ;;  %v290_v53 = vadd.f32 %v289_v51, %v1955_v58 }
  0xfa   :  { %v459_v54 = vadd.f32 %v458_v52, %v1958_v59 }
  0xfb   :  { %1422 = vmatmul.msk.bf16.gmra.mxu0 %vm148_vm0, %v101_v50  ;;  %v611_v61 = vmax.f32 %v290_v53, 0.0 }
  0xfc   :  { %1454 = vmatmul.msk.bf16.gmra.mxu1 %vm148_vm0, %v101_v50  ;;  %v612_v63 = vmax.f32 %v459_v54, 0.0 }
 0x100   :  { %v291_v55 = vpop.f32.mrf.mxu0 }
 0x101   :  { %v292_v56 = vadd.f32 %v291_v55, %v1955_v58  ;;  %v460_v57 = vpop.f32.mrf.mxu1 }
 0x102   :  { %v461_v60 = vadd.f32 %v460_v57, %v1958_v59 }
 0x103   :  { %v613_v62 = vmax.f32 %v292_v56, 0.0 }
 0x104   :  { %v614_v0 = vmax.f32 %v461_v60, 0.0 }
 0x105   :  { %v725_v3 = vpack.c.bf16 %v613_v62, %v611_v61 }
 0x106   :  { %v726_v4 = vpack.c.bf16 %v614_v0, %v612_v63 }
 0x107   :  { %950 = vmatmul.bf16.gmra.mxu2 %v725_v3 }
 0x108   :  { %1119 = vmatmul.bf16.gmra.mxu3 %v726_v4  ;;  %v294_v6 = vpop.f32.mrf.mxu0 }
 0x109   :  { %v463_v7 = vpop.f32.mrf.mxu1  ;;  %v295_v8 = vadd.f32 %v294_v6, %v1955_v58  ;;  %v60_v6 = vld [vmem:[%s2350_s0 + $0x130] sm:$0xff] }
 0x10a   :  { %v464_v9 = vadd.f32 %v463_v7, %v1958_v59  ;;  %v61_v7 = vld [vmem:[%s2350_s0 + $0x138] sm:$0xff] }
 0x10b   :  { %1423 = vmatmul.msk.bf16.gmra.mxu0 %vm148_vm0, %v102_v5  ;;  %v615_v14 = vmax.f32 %v295_v8, 0.0 }
 0x10c   :  { %1455 = vmatmul.msk.bf16.gmra.mxu1 %vm148_vm0, %v102_v5  ;;  %v616_v16 = vmax.f32 %v464_v9, 0.0 }
 0x110   :  { %v296_v10 = vpop.f32.mrf.mxu0 }
 0x111   :  { %v297_v11 = vadd.f32 %v296_v10, %v1955_v58  ;;  %v465_v12 = vpop.f32.mrf.mxu1 }
 0x112   :  { %v466_v13 = vadd.f32 %v465_v12, %v1958_v59 }
 0x113   :  { %v617_v15 = vmax.f32 %v297_v11, 0.0 }
 0x114   :  { %v618_v17 = vmax.f32 %v466_v13, 0.0  ;;  %v105_v13 = vpack.c.bf16 %v61_v7, %v60_v6 }
 0x115   :  { %v727_v20 = vpack.c.bf16 %v617_v15, %v615_v14 }
 0x116   :  { %v728_v21 = vpack.c.bf16 %v618_v17, %v616_v16 }
 0x117   :  { %955 = vmatmul.bf16.gmra.mxu2 %v727_v20 }
 0x118   :  { %1124 = vmatmul.bf16.gmra.mxu3 %v728_v21  ;;  %v299_v23 = vpop.f32.mrf.mxu0 }
 0x119   :  { %v468_v24 = vpop.f32.mrf.mxu1  ;;  %v300_v28 = vadd.f32 %v299_v23, %v1955_v58 }
 0x11a   :  { %v916_v25 = vpop.f32.mrf.mxu2  ;;  %v469_v29 = vadd.f32 %v468_v24, %v1958_v59 }
 0x11b   :  { %v1085_v26 = vpop.f32.mrf.mxu3  ;;  %1424 = vmatmul.msk.bf16.gmra.mxu0 %vm148_vm0, %v103_v22  ;;  %v917_v31 = vadd.f32 %v2072_v27, %v916_v25  ;;  %v619_v36 = vmax.f32 %v300_v28, 0.0 }
 0x11c   :  { %1456 = vmatmul.msk.bf16.gmra.mxu1 %vm148_vm0, %v103_v22  ;;  %v620_v40 = vmax.f32 %v469_v29, 0.0 }
 0x11d   :  { %v1086_v44 = vadd.f32 %v1085_v26, %v917_v31 }
 0x120   :  { %v301_v30 = vpop.f32.mrf.mxu0 }
 0x121   :  { %v302_v32 = vadd.f32 %v301_v30, %v1955_v58  ;;  %v470_v33 = vpop.f32.mrf.mxu1 }
 0x122   :  { %v471_v34 = vadd.f32 %v470_v33, %v1958_v59  ;;  %v918_v35 = vpop.f32.mrf.mxu2  ;;  %v62_v33 = vld [vmem:[%s2350_s0 + $0x140] sm:$0xff] }
 0x123   :  { %v621_v37 = vmax.f32 %v302_v32, 0.0  ;;  %v919_v38 = vadd.f32 %v2072_v27, %v918_v35  ;;  %v1087_v39 = vpop.f32.mrf.mxu3 }
 0x124   :  { %v622_v41 = vmax.f32 %v471_v34, 0.0  ;;  %v63_v34 = vld [vmem:[%s2350_s0 + $0x148] sm:$0xff] }
 0x125   :  { %v1088_v45 = vadd.f32 %v1087_v39, %v919_v38  ;;  %v729_v46 = vpack.c.bf16 %v621_v37, %v619_v36 }
 0x126   :  { %v730_v47 = vpack.c.bf16 %v622_v41, %v620_v40  ;;  %v106_v40 = vpack.c.bf16 %v63_v34, %v62_v33 }
 0x127   :  { %v1558_v48 = vpack.c.bf16 %v1088_v45, %v1086_v44  ;;  %960 = vmatmul.bf16.gmra.mxu2 %v729_v46 }
 0x128   :  { %1129 = vmatmul.bf16.gmra.mxu3 %v730_v47  ;;  %v304_v50 = vpop.f32.mrf.mxu0 }
 0x129   :  { %1559 = vst [vmem:[#allocation2] sm:$0xff] %v1558_v48   ;;  %v473_v51 = vpop.f32.mrf.mxu1  ;;  %v305_v54 = vadd.f32 %v304_v50, %v1955_v58 }
 0x12a   :  { %v921_v52 = vpop.f32.mrf.mxu2  ;;  %v474_v55 = vadd.f32 %v473_v51, %v1958_v59 }
 0x12b   :  { %v1090_v53 = vpop.f32.mrf.mxu3  ;;  %1425 = vmatmul.msk.bf16.gmra.mxu0 %vm148_vm0, %v104_v49  ;;  %v922_v57 = vadd.f32 %v2072_v27, %v921_v52  ;;  %v623_v0 = vmax.f32 %v305_v54, 0.0 }
 0x12c   :  { %1457 = vmatmul.msk.bf16.gmra.mxu1 %vm148_vm0, %v104_v49  ;;  %v624_v4 = vmax.f32 %v474_v55, 0.0 }
 0x12d   :  { %v1091_v8 = vadd.f32 %v1090_v53, %v922_v57 }
 0x130   :  { %v306_v56 = vpop.f32.mrf.mxu0 }
 0x131   :  { %v307_v60 = vadd.f32 %v306_v56, %v1955_v58  ;;  %v475_v61 = vpop.f32.mrf.mxu1 }
 0x132   :  { %v476_v62 = vadd.f32 %v475_v61, %v1958_v59  ;;  %v923_v63 = vpop.f32.mrf.mxu2  ;;  %v64_v61 = vld [vmem:[%s2350_s0 + $0x150] sm:$0xff] }
 0x133   :  { %v625_v1 = vmax.f32 %v307_v60, 0.0  ;;  %v924_v2 = vadd.f32 %v2072_v27, %v923_v63  ;;  %v1092_v3 = vpop.f32.mrf.mxu3 }
 0x134   :  { %v626_v5 = vmax.f32 %v476_v62, 0.0  ;;  %v65_v62 = vld [vmem:[%s2350_s0 + $0x158] sm:$0xff] }
 0x135   :  { %v1093_v9 = vadd.f32 %v1092_v3, %v924_v2  ;;  %v731_v10 = vpack.c.bf16 %v625_v1, %v623_v0 }
 0x136   :  { %v732_v11 = vpack.c.bf16 %v626_v5, %v624_v4  ;;  %v107_v4 = vpack.c.bf16 %v65_v62, %v64_v61 }
 0x137   :  { %v1563_v12 = vpack.c.bf16 %v1093_v9, %v1091_v8  ;;  %965 = vmatmul.bf16.gmra.mxu2 %v731_v10 }
 0x138   :  { %1134 = vmatmul.bf16.gmra.mxu3 %v732_v11  ;;  %v309_v14 = vpop.f32.mrf.mxu0 }
 0x139   :  { %1715 = vst [vmem:[#allocation2 + $0x8] sm:$0xff] %v1563_v12   ;;  %v478_v15 = vpop.f32.mrf.mxu1  ;;  %v310_v18 = vadd.f32 %v309_v14, %v1955_v58 }
 0x13a   :  { %v926_v16 = vpop.f32.mrf.mxu2  ;;  %v479_v19 = vadd.f32 %v478_v15, %v1958_v59 }
 0x13b   :  { %v1095_v17 = vpop.f32.mrf.mxu3  ;;  %1426 = vmatmul.msk.bf16.gmra.mxu0 %vm148_vm0, %v105_v13  ;;  %v927_v21 = vadd.f32 %v2072_v27, %v926_v16  ;;  %v627_v26 = vmax.f32 %v310_v18, 0.0 }
 0x13c   :  { %1458 = vmatmul.msk.bf16.gmra.mxu1 %vm148_vm0, %v105_v13  ;;  %v628_v31 = vmax.f32 %v479_v19, 0.0 }
 0x13d   :  { %v1096_v35 = vadd.f32 %v1095_v17, %v927_v21 }
 0x140   :  { %v311_v20 = vpop.f32.mrf.mxu0 }
 0x141   :  { %v312_v22 = vadd.f32 %v311_v20, %v1955_v58  ;;  %v480_v23 = vpop.f32.mrf.mxu1 }
 0x142   :  { %v481_v24 = vadd.f32 %v480_v23, %v1958_v59  ;;  %v928_v25 = vpop.f32.mrf.mxu2  ;;  %v66_v23 = vld [vmem:[%s2350_s0 + $0x160] sm:$0xff] }
 0x143   :  { %v629_v28 = vmax.f32 %v312_v22, 0.0  ;;  %v929_v29 = vadd.f32 %v2072_v27, %v928_v25  ;;  %v1097_v30 = vpop.f32.mrf.mxu3 }
 0x144   :  { %v630_v32 = vmax.f32 %v481_v24, 0.0  ;;  %v67_v24 = vld [vmem:[%s2350_s0 + $0x168] sm:$0xff] }
 0x145   :  { %v1098_v36 = vadd.f32 %v1097_v30, %v929_v29  ;;  %v733_v37 = vpack.c.bf16 %v629_v28, %v627_v26 }
 0x146   :  { %v734_v38 = vpack.c.bf16 %v630_v32, %v628_v31  ;;  %v108_v31 = vpack.c.bf16 %v67_v24, %v66_v23 }
 0x147   :  { %v1568_v39 = vpack.c.bf16 %v1098_v36, %v1096_v35  ;;  %970 = vmatmul.bf16.gmra.mxu2 %v733_v37 }
 0x148   :  { %1139 = vmatmul.bf16.gmra.mxu3 %v734_v38  ;;  %v314_v41 = vpop.f32.mrf.mxu0 }
 0x149   :  { %1716 = vst [vmem:[#allocation2 + $0x10] sm:$0xff] %v1568_v39   ;;  %v483_v42 = vpop.f32.mrf.mxu1  ;;  %v315_v45 = vadd.f32 %v314_v41, %v1955_v58 }
 0x14a   :  { %v931_v43 = vpop.f32.mrf.mxu2  ;;  %v484_v46 = vadd.f32 %v483_v42, %v1958_v59 }
 0x14b   :  { %v1100_v44 = vpop.f32.mrf.mxu3  ;;  %1427 = vmatmul.msk.bf16.gmra.mxu0 %vm148_vm0, %v106_v40  ;;  %v932_v48 = vadd.f32 %v2072_v27, %v931_v43  ;;  %v631_v53 = vmax.f32 %v315_v45, 0.0 }
 0x14c   :  { %1459 = vmatmul.msk.bf16.gmra.mxu1 %vm148_vm0, %v106_v40  ;;  %v632_v57 = vmax.f32 %v484_v46, 0.0 }
 0x14d   :  { %v1101_v63 = vadd.f32 %v1100_v44, %v932_v48 }
 0x150   :  { %v316_v47 = vpop.f32.mrf.mxu0 }
 0x151   :  { %v317_v49 = vadd.f32 %v316_v47, %v1955_v58  ;;  %v485_v50 = vpop.f32.mrf.mxu1 }
 0x152   :  { %v486_v51 = vadd.f32 %v485_v50, %v1958_v59  ;;  %v933_v52 = vpop.f32.mrf.mxu2  ;;  %v68_v50 = vld [vmem:[%s2350_s0 + $0x170] sm:$0xff] }
 0x153   :  { %v633_v54 = vmax.f32 %v317_v49, 0.0  ;;  %v934_v55 = vadd.f32 %v2072_v27, %v933_v52  ;;  %v1102_v56 = vpop.f32.mrf.mxu3 }
 0x154   :  { %v634_v60 = vmax.f32 %v486_v51, 0.0  ;;  %v69_v51 = vld [vmem:[%s2350_s0 + $0x178] sm:$0xff] }
 0x155   :  { %v1103_v0 = vadd.f32 %v1102_v56, %v934_v55  ;;  %v735_v1 = vpack.c.bf16 %v633_v54, %v631_v53 }
 0x156   :  { %v736_v2 = vpack.c.bf16 %v634_v60, %v632_v57  ;;  %v109_v57 = vpack.c.bf16 %v69_v51, %v68_v50 }
 0x157   :  { %v1573_v3 = vpack.c.bf16 %v1103_v0, %v1101_v63  ;;  %975 = vmatmul.bf16.gmra.mxu2 %v735_v1 }
 0x158   :  { %1144 = vmatmul.bf16.gmra.mxu3 %v736_v2  ;;  %v319_v5 = vpop.f32.mrf.mxu0 }
 0x159   :  { %1717 = vst [vmem:[#allocation2 + $0x18] sm:$0xff] %v1573_v3   ;;  %v488_v6 = vpop.f32.mrf.mxu1  ;;  %v320_v9 = vadd.f32 %v319_v5, %v1955_v58 }
 0x15a   :  { %v936_v7 = vpop.f32.mrf.mxu2  ;;  %v489_v10 = vadd.f32 %v488_v6, %v1958_v59 }
 0x15b   :  { %v1105_v8 = vpop.f32.mrf.mxu3  ;;  %1428 = vmatmul.msk.bf16.gmra.mxu0 %vm148_vm0, %v107_v4  ;;  %v937_v12 = vadd.f32 %v2072_v27, %v936_v7  ;;  %v635_v17 = vmax.f32 %v320_v9, 0.0 }
 0x15c   :  { %1460 = vmatmul.msk.bf16.gmra.mxu1 %vm148_vm0, %v107_v4  ;;  %v636_v21 = vmax.f32 %v489_v10, 0.0 }
 0x15d   :  { %v1106_v25 = vadd.f32 %v1105_v8, %v937_v12 }
 0x160   :  { %v321_v11 = vpop.f32.mrf.mxu0 }
 0x161   :  { %v322_v13 = vadd.f32 %v321_v11, %v1955_v58  ;;  %v490_v14 = vpop.f32.mrf.mxu1 }
 0x162   :  { %v491_v15 = vadd.f32 %v490_v14, %v1958_v59  ;;  %v938_v16 = vpop.f32.mrf.mxu2  ;;  %v70_v14 = vld [vmem:[%s2350_s0 + $0x180] sm:$0xff] }
 0x163   :  { %v637_v18 = vmax.f32 %v322_v13, 0.0  ;;  %v939_v19 = vadd.f32 %v2072_v27, %v938_v16  ;;  %v1107_v20 = vpop.f32.mrf.mxu3 }
 0x164   :  { %v638_v22 = vmax.f32 %v491_v15, 0.0  ;;  %v71_v15 = vld [vmem:[%s2350_s0 + $0x188] sm:$0xff] }
 0x165   :  { %v1108_v26 = vadd.f32 %v1107_v20, %v939_v19  ;;  %v737_v28 = vpack.c.bf16 %v637_v18, %v635_v17 }
 0x166   :  { %v738_v29 = vpack.c.bf16 %v638_v22, %v636_v21  ;;  %v110_v21 = vpack.c.bf16 %v71_v15, %v70_v14 }
 0x167   :  { %v1578_v30 = vpack.c.bf16 %v1108_v26, %v1106_v25  ;;  %980 = vmatmul.bf16.gmra.mxu2 %v737_v28 }
 0x168   :  { %1149 = vmatmul.bf16.gmra.mxu3 %v738_v29  ;;  %v324_v32 = vpop.f32.mrf.mxu0 }
 0x169   :  { %1718 = vst [vmem:[#allocation2 + $0x20] sm:$0xff] %v1578_v30   ;;  %v493_v33 = vpop.f32.mrf.mxu1  ;;  %v325_v36 = vadd.f32 %v324_v32, %v1955_v58 }
 0x16a   :  { %v941_v34 = vpop.f32.mrf.mxu2  ;;  %v494_v37 = vadd.f32 %v493_v33, %v1958_v59 }
 0x16b   :  { %v1110_v35 = vpop.f32.mrf.mxu3  ;;  %1429 = vmatmul.msk.bf16.gmra.mxu0 %vm148_vm0, %v108_v31  ;;  %v942_v39 = vadd.f32 %v2072_v27, %v941_v34  ;;  %v639_v44 = vmax.f32 %v325_v36, 0.0 }
 0x16c   :  { %1461 = vmatmul.msk.bf16.gmra.mxu1 %vm148_vm0, %v108_v31  ;;  %v640_v48 = vmax.f32 %v494_v37, 0.0 }
 0x16d   :  { %v1111_v52 = vadd.f32 %v1110_v35, %v942_v39 }
 0x170   :  { %v326_v38 = vpop.f32.mrf.mxu0 }
 0x171   :  { %v327_v40 = vadd.f32 %v326_v38, %v1955_v58  ;;  %v495_v41 = vpop.f32.mrf.mxu1 }
 0x172   :  { %v496_v42 = vadd.f32 %v495_v41, %v1958_v59  ;;  %v943_v43 = vpop.f32.mrf.mxu2  ;;  %v72_v41 = vld [vmem:[%s2350_s0 + $0x190] sm:$0xff] }
 0x173   :  { %v641_v45 = vmax.f32 %v327_v40, 0.0  ;;  %v944_v46 = vadd.f32 %v2072_v27, %v943_v43  ;;  %v1112_v47 = vpop.f32.mrf.mxu3 }
 0x174   :  { %v642_v49 = vmax.f32 %v496_v42, 0.0  ;;  %v73_v42 = vld [vmem:[%s2350_s0 + $0x198] sm:$0xff] }
 0x175   :  { %v1113_v53 = vadd.f32 %v1112_v47, %v944_v46  ;;  %v739_v54 = vpack.c.bf16 %v641_v45, %v639_v44 }
 0x176   :  { %v740_v55 = vpack.c.bf16 %v642_v49, %v640_v48  ;;  %v111_v48 = vpack.c.bf16 %v73_v42, %v72_v41 }
 0x177   :  { %v1583_v56 = vpack.c.bf16 %v1113_v53, %v1111_v52  ;;  %985 = vmatmul.bf16.gmra.mxu2 %v739_v54 }
 0x178   :  { %1154 = vmatmul.bf16.gmra.mxu3 %v740_v55  ;;  %v329_v60 = vpop.f32.mrf.mxu0 }
 0x179   :  { %1719 = vst [vmem:[#allocation2 + $0x28] sm:$0xff] %v1583_v56   ;;  %v498_v61 = vpop.f32.mrf.mxu1  ;;  %v330_v0 = vadd.f32 %v329_v60, %v1955_v58 }
 0x17a   :  { %v946_v62 = vpop.f32.mrf.mxu2  ;;  %v499_v1 = vadd.f32 %v498_v61, %v1958_v59 }
 0x17b   :  { %v1115_v63 = vpop.f32.mrf.mxu3  ;;  %1430 = vmatmul.msk.bf16.gmra.mxu0 %vm148_vm0, %v109_v57  ;;  %v947_v3 = vadd.f32 %v2072_v27, %v946_v62  ;;  %v643_v8 = vmax.f32 %v330_v0, 0.0 }
 0x17c   :  { %1462 = vmatmul.msk.bf16.gmra.mxu1 %vm148_vm0, %v109_v57  ;;  %v644_v12 = vmax.f32 %v499_v1, 0.0 }
 0x17d   :  { %v1116_v16 = vadd.f32 %v1115_v63, %v947_v3 }
 0x180   :  { %v331_v2 = vpop.f32.mrf.mxu0 }
 0x181   :  { %v332_v4 = vadd.f32 %v331_v2, %v1955_v58  ;;  %v500_v5 = vpop.f32.mrf.mxu1 }
 0x182   :  { %v501_v6 = vadd.f32 %v500_v5, %v1958_v59  ;;  %v948_v7 = vpop.f32.mrf.mxu2  ;;  %v74_v5 = vld [vmem:[%s2350_s0 + $0x1a0] sm:$0xff] }
 0x183   :  { %v645_v9 = vmax.f32 %v332_v4, 0.0  ;;  %v949_v10 = vadd.f32 %v2072_v27, %v948_v7  ;;  %v1117_v11 = vpop.f32.mrf.mxu3 }
 0x184   :  { %v646_v13 = vmax.f32 %v501_v6, 0.0  ;;  %v75_v6 = vld [vmem:[%s2350_s0 + $0x1a8] sm:$0xff] }
 0x185   :  { %v1118_v17 = vadd.f32 %v1117_v11, %v949_v10  ;;  %v741_v18 = vpack.c.bf16 %v645_v9, %v643_v8 }
 0x186   :  { %v742_v19 = vpack.c.bf16 %v646_v13, %v644_v12  ;;  %v112_v12 = vpack.c.bf16 %v75_v6, %v74_v5 }
 0x187   :  { %v1588_v20 = vpack.c.bf16 %v1118_v17, %v1116_v16  ;;  %990 = vmatmul.bf16.gmra.mxu2 %v741_v18 }
 0x188   :  { %1159 = vmatmul.bf16.gmra.mxu3 %v742_v19  ;;  %v334_v22 = vpop.f32.mrf.mxu0 }
 0x189   :  { %1720 = vst [vmem:[#allocation2 + $0x30] sm:$0xff] %v1588_v20   ;;  %v503_v23 = vpop.f32.mrf.mxu1  ;;  %v335_v26 = vadd.f32 %v334_v22, %v1955_v58 }
 0x18a   :  { %v951_v24 = vpop.f32.mrf.mxu2  ;;  %v504_v28 = vadd.f32 %v503_v23, %v1958_v59 }
 0x18b   :  { %v1120_v25 = vpop.f32.mrf.mxu3  ;;  %1431 = vmatmul.msk.bf16.gmra.mxu0 %vm148_vm0, %v110_v21  ;;  %v952_v30 = vadd.f32 %v2072_v27, %v951_v24  ;;  %v647_v35 = vmax.f32 %v335_v26, 0.0 }
 0x18c   :  { %1463 = vmatmul.msk.bf16.gmra.mxu1 %vm148_vm0, %v110_v21  ;;  %v648_v39 = vmax.f32 %v504_v28, 0.0 }
 0x18d   :  { %v1121_v43 = vadd.f32 %v1120_v25, %v952_v30 }
 0x190   :  { %v336_v29 = vpop.f32.mrf.mxu0 }
 0x191   :  { %v337_v31 = vadd.f32 %v336_v29, %v1955_v58  ;;  %v505_v32 = vpop.f32.mrf.mxu1 }
 0x192   :  { %v506_v33 = vadd.f32 %v505_v32, %v1958_v59  ;;  %v953_v34 = vpop.f32.mrf.mxu2  ;;  %v76_v32 = vld [vmem:[%s2350_s0 + $0x1b0] sm:$0xff] }
 0x193   :  { %v649_v36 = vmax.f32 %v337_v31, 0.0  ;;  %v954_v37 = vadd.f32 %v2072_v27, %v953_v34  ;;  %v1122_v38 = vpop.f32.mrf.mxu3 }
 0x194   :  { %v650_v40 = vmax.f32 %v506_v33, 0.0  ;;  %v77_v33 = vld [vmem:[%s2350_s0 + $0x1b8] sm:$0xff] }
 0x195   :  { %v1123_v44 = vadd.f32 %v1122_v38, %v954_v37  ;;  %v743_v45 = vpack.c.bf16 %v649_v36, %v647_v35 }
 0x196   :  { %v744_v46 = vpack.c.bf16 %v650_v40, %v648_v39  ;;  %v113_v39 = vpack.c.bf16 %v77_v33, %v76_v32 }
 0x197   :  { %v1593_v47 = vpack.c.bf16 %v1123_v44, %v1121_v43  ;;  %995 = vmatmul.bf16.gmra.mxu2 %v743_v45 }
 0x198   :  { %1164 = vmatmul.bf16.gmra.mxu3 %v744_v46  ;;  %v339_v49 = vpop.f32.mrf.mxu0 }
 0x199   :  { %1721 = vst [vmem:[#allocation2 + $0x38] sm:$0xff] %v1593_v47   ;;  %v508_v50 = vpop.f32.mrf.mxu1  ;;  %v340_v53 = vadd.f32 %v339_v49, %v1955_v58 }
 0x19a   :  { %v956_v51 = vpop.f32.mrf.mxu2  ;;  %v509_v54 = vadd.f32 %v508_v50, %v1958_v59 }
 0x19b   :  { %v1125_v52 = vpop.f32.mrf.mxu3  ;;  %1432 = vmatmul.msk.bf16.gmra.mxu0 %vm148_vm0, %v111_v48  ;;  %v957_v56 = vadd.f32 %v2072_v27, %v956_v51  ;;  %v651_v63 = vmax.f32 %v340_v53, 0.0 }
 0x19c   :  { %1464 = vmatmul.msk.bf16.gmra.mxu1 %vm148_vm0, %v111_v48  ;;  %v652_v3 = vmax.f32 %v509_v54, 0.0 }
 0x19d   :  { %v1126_v7 = vadd.f32 %v1125_v52, %v957_v56 }
 0x1a0   :  { %v341_v55 = vpop.f32.mrf.mxu0 }
 0x1a1   :  { %v342_v57 = vadd.f32 %v341_v55, %v1955_v58  ;;  %v510_v60 = vpop.f32.mrf.mxu1 }
 0x1a2   :  { %v511_v61 = vadd.f32 %v510_v60, %v1958_v59  ;;  %v958_v62 = vpop.f32.mrf.mxu2  ;;  %v78_v60 = vld [vmem:[%s2350_s0 + $0x1c0] sm:$0xff] }
 0x1a3   :  { %v653_v0 = vmax.f32 %v342_v57, 0.0  ;;  %v959_v1 = vadd.f32 %v2072_v27, %v958_v62  ;;  %v1127_v2 = vpop.f32.mrf.mxu3 }
 0x1a4   :  { %v654_v4 = vmax.f32 %v511_v61, 0.0  ;;  %v79_v61 = vld [vmem:[%s2350_s0 + $0x1c8] sm:$0xff] }
 0x1a5   :  { %v1128_v8 = vadd.f32 %v1127_v2, %v959_v1  ;;  %v745_v9 = vpack.c.bf16 %v653_v0, %v651_v63 }
 0x1a6   :  { %v746_v10 = vpack.c.bf16 %v654_v4, %v652_v3  ;;  %v114_v3 = vpack.c.bf16 %v79_v61, %v78_v60 }
 0x1a7   :  { %v1598_v11 = vpack.c.bf16 %v1128_v8, %v1126_v7  ;;  %1000 = vmatmul.bf16.gmra.mxu2 %v745_v9 }
 0x1a8   :  { %1169 = vmatmul.bf16.gmra.mxu3 %v746_v10  ;;  %v344_v13 = vpop.f32.mrf.mxu0 }
 0x1a9   :  { %1722 = vst [vmem:[#allocation2 + $0x40] sm:$0xff] %v1598_v11   ;;  %v513_v14 = vpop.f32.mrf.mxu1  ;;  %v345_v17 = vadd.f32 %v344_v13, %v1955_v58 }
 0x1aa   :  { %v961_v15 = vpop.f32.mrf.mxu2  ;;  %v514_v18 = vadd.f32 %v513_v14, %v1958_v59 }
 0x1ab   :  { %v1130_v16 = vpop.f32.mrf.mxu3  ;;  %1433 = vmatmul.msk.bf16.gmra.mxu0 %vm148_vm0, %v112_v12  ;;  %v962_v20 = vadd.f32 %v2072_v27, %v961_v15  ;;  %v655_v25 = vmax.f32 %v345_v17, 0.0 }
 0x1ac   :  { %1465 = vmatmul.msk.bf16.gmra.mxu1 %vm148_vm0, %v112_v12  ;;  %v656_v30 = vmax.f32 %v514_v18, 0.0 }
 0x1ad   :  { %v1131_v34 = vadd.f32 %v1130_v16, %v962_v20 }
 0x1b0   :  { %v346_v19 = vpop.f32.mrf.mxu0 }
 0x1b1   :  { %v347_v21 = vadd.f32 %v346_v19, %v1955_v58  ;;  %v515_v22 = vpop.f32.mrf.mxu1 }
 0x1b2   :  { %v516_v23 = vadd.f32 %v515_v22, %v1958_v59  ;;  %v963_v24 = vpop.f32.mrf.mxu2  ;;  %v80_v22 = vld [vmem:[%s2350_s0 + $0x1d0] sm:$0xff] }
 0x1b3   :  { %v657_v26 = vmax.f32 %v347_v21, 0.0  ;;  %v964_v28 = vadd.f32 %v2072_v27, %v963_v24  ;;  %v1132_v29 = vpop.f32.mrf.mxu3 }
 0x1b4   :  { %v658_v31 = vmax.f32 %v516_v23, 0.0  ;;  %v81_v23 = vld [vmem:[%s2350_s0 + $0x1d8] sm:$0xff] }
 0x1b5   :  { %v1133_v35 = vadd.f32 %v1132_v29, %v964_v28  ;;  %v747_v36 = vpack.c.bf16 %v657_v26, %v655_v25 }
 0x1b6   :  { %v748_v37 = vpack.c.bf16 %v658_v31, %v656_v30  ;;  %v115_v30 = vpack.c.bf16 %v81_v23, %v80_v22 }
 0x1b7   :  { %v1603_v38 = vpack.c.bf16 %v1133_v35, %v1131_v34  ;;  %1005 = vmatmul.bf16.gmra.mxu2 %v747_v36 }
 0x1b8   :  { %1174 = vmatmul.bf16.gmra.mxu3 %v748_v37  ;;  %v349_v40 = vpop.f32.mrf.mxu0 }
 0x1b9   :  { %1723 = vst [vmem:[#allocation2 + $0x48] sm:$0xff] %v1603_v38   ;;  %v518_v41 = vpop.f32.mrf.mxu1  ;;  %v350_v44 = vadd.f32 %v349_v40, %v1955_v58 }
 0x1ba   :  { %v966_v42 = vpop.f32.mrf.mxu2  ;;  %v519_v45 = vadd.f32 %v518_v41, %v1958_v59 }
 0x1bb   :  { %v1135_v43 = vpop.f32.mrf.mxu3  ;;  %1434 = vmatmul.msk.bf16.gmra.mxu0 %vm148_vm0, %v113_v39  ;;  %v967_v47 = vadd.f32 %v2072_v27, %v966_v42  ;;  %v659_v52 = vmax.f32 %v350_v44, 0.0 }
 0x1bc   :  { %1466 = vmatmul.msk.bf16.gmra.mxu1 %vm148_vm0, %v113_v39  ;;  %v660_v56 = vmax.f32 %v519_v45, 0.0 }
 0x1bd   :  { %v1136_v62 = vadd.f32 %v1135_v43, %v967_v47 }
 0x1c0   :  { %v351_v46 = vpop.f32.mrf.mxu0 }
 0x1c1   :  { %v352_v48 = vadd.f32 %v351_v46, %v1955_v58  ;;  %v520_v49 = vpop.f32.mrf.mxu1 }
 0x1c2   :  { %v521_v50 = vadd.f32 %v520_v49, %v1958_v59  ;;  %v968_v51 = vpop.f32.mrf.mxu2  ;;  %v82_v49 = vld [vmem:[%s2350_s0 + $0x1e0] sm:$0xff] }
 0x1c3   :  { %v661_v53 = vmax.f32 %v352_v48, 0.0  ;;  %v969_v54 = vadd.f32 %v2072_v27, %v968_v51  ;;  %v1137_v55 = vpop.f32.mrf.mxu3 }
 0x1c4   :  { %v662_v57 = vmax.f32 %v521_v50, 0.0  ;;  %v83_v50 = vld [vmem:[%s2350_s0 + $0x1e8] sm:$0xff] }
 0x1c5   :  { %v1138_v63 = vadd.f32 %v1137_v55, %v969_v54  ;;  %v749_v0 = vpack.c.bf16 %v661_v53, %v659_v52 }
 0x1c6   :  { %v750_v1 = vpack.c.bf16 %v662_v57, %v660_v56  ;;  %v116_v56 = vpack.c.bf16 %v83_v50, %v82_v49 }
 0x1c7   :  { %v1608_v2 = vpack.c.bf16 %v1138_v63, %v1136_v62  ;;  %1010 = vmatmul.bf16.gmra.mxu2 %v749_v0 }
 0x1c8   :  { %1179 = vmatmul.bf16.gmra.mxu3 %v750_v1  ;;  %v354_v4 = vpop.f32.mrf.mxu0 }
 0x1c9   :  { %1724 = vst [vmem:[#allocation2 + $0x50] sm:$0xff] %v1608_v2   ;;  %v523_v5 = vpop.f32.mrf.mxu1  ;;  %v355_v8 = vadd.f32 %v354_v4, %v1955_v58 }
 0x1ca   :  { %v971_v6 = vpop.f32.mrf.mxu2  ;;  %v524_v9 = vadd.f32 %v523_v5, %v1958_v59 }
 0x1cb   :  { %v1140_v7 = vpop.f32.mrf.mxu3  ;;  %1435 = vmatmul.msk.bf16.gmra.mxu0 %vm148_vm0, %v114_v3  ;;  %v972_v11 = vadd.f32 %v2072_v27, %v971_v6  ;;  %v663_v16 = vmax.f32 %v355_v8, 0.0 }
 0x1cc   :  { %1467 = vmatmul.msk.bf16.gmra.mxu1 %vm148_vm0, %v114_v3  ;;  %v664_v20 = vmax.f32 %v524_v9, 0.0 }
 0x1cd   :  { %v1141_v24 = vadd.f32 %v1140_v7, %v972_v11 }
 0x1d0   :  { %v356_v10 = vpop.f32.mrf.mxu0 }
 0x1d1   :  { %v357_v12 = vadd.f32 %v356_v10, %v1955_v58  ;;  %v525_v13 = vpop.f32.mrf.mxu1 }
 0x1d2   :  { %v526_v14 = vadd.f32 %v525_v13, %v1958_v59  ;;  %v973_v15 = vpop.f32.mrf.mxu2  ;;  %v84_v13 = vld [vmem:[%s2350_s0 + $0x1f0] sm:$0xff] }
 0x1d3   :  { %v665_v17 = vmax.f32 %v357_v12, 0.0  ;;  %v974_v18 = vadd.f32 %v2072_v27, %v973_v15  ;;  %v1142_v19 = vpop.f32.mrf.mxu3 }
 0x1d4   :  { %v666_v21 = vmax.f32 %v526_v14, 0.0  ;;  %v85_v14 = vld [vmem:[%s2350_s0 + $0x1f8] sm:$0xff] }
 0x1d5   :  { %v751_v25 = vpack.c.bf16 %v665_v17, %v663_v16  ;;  %v1143_v26 = vadd.f32 %v1142_v19, %v974_v18 }
 0x1d6   :  { %v752_v28 = vpack.c.bf16 %v666_v21, %v664_v20  ;;  %v117_v20 = vpack.c.bf16 %v85_v14, %v84_v13 }
 0x1d7   :  { %v1613_v29 = vpack.c.bf16 %v1143_v26, %v1141_v24  ;;  %1015 = vmatmul.bf16.gmra.mxu2 %v751_v25 }
 0x1d8   :  { %1184 = vmatmul.bf16.gmra.mxu3 %v752_v28  ;;  %v359_v31 = vpop.f32.mrf.mxu0 }
 0x1d9   :  { %1725 = vst [vmem:[#allocation2 + $0x58] sm:$0xff] %v1613_v29   ;;  %v528_v32 = vpop.f32.mrf.mxu1  ;;  %v360_v35 = vadd.f32 %v359_v31, %v1955_v58 }
 0x1da   :  { %v976_v33 = vpop.f32.mrf.mxu2  ;;  %v529_v36 = vadd.f32 %v528_v32, %v1958_v59 }
 0x1db   :  { %v1145_v34 = vpop.f32.mrf.mxu3  ;;  %1436 = vmatmul.msk.bf16.gmra.mxu0 %vm148_vm0, %v115_v30  ;;  %v977_v38 = vadd.f32 %v2072_v27, %v976_v33  ;;  %v667_v43 = vmax.f32 %v360_v35, 0.0 }
 0x1dc   :  { %1468 = vmatmul.msk.bf16.gmra.mxu1 %vm148_vm0, %v115_v30  ;;  %v668_v47 = vmax.f32 %v529_v36, 0.0 }
 0x1dd   :  { %v1146_v51 = vadd.f32 %v1145_v34, %v977_v38 }
 0x1e0   :  { %v361_v37 = vpop.f32.mrf.mxu0 }
 0x1e1   :  { %v362_v39 = vadd.f32 %v361_v37, %v1955_v58  ;;  %v530_v40 = vpop.f32.mrf.mxu1 }
 0x1e2   :  { %v531_v41 = vadd.f32 %v530_v40, %v1958_v59  ;;  %v978_v42 = vpop.f32.mrf.mxu2 }
 0x1e3   :  { %v669_v44 = vmax.f32 %v362_v39, 0.0  ;;  %v979_v45 = vadd.f32 %v2072_v27, %v978_v42  ;;  %v1147_v46 = vpop.f32.mrf.mxu3 }
 0x1e4   :  { %v670_v48 = vmax.f32 %v531_v41, 0.0 }
 0x1e5   :  { %v753_v52 = vpack.c.bf16 %v669_v44, %v667_v43  ;;  %v1148_v53 = vadd.f32 %v1147_v46, %v979_v45 }
 0x1e6   :  { %v754_v54 = vpack.c.bf16 %v670_v48, %v668_v47 }
 0x1e7   :  { %v1618_v55 = vpack.c.bf16 %v1148_v53, %v1146_v51  ;;  %1020 = vmatmul.bf16.gmra.mxu2 %v753_v52 }
 0x1e8   :  { %1189 = vmatmul.bf16.gmra.mxu3 %v754_v54  ;;  %v364_v57 = vpop.f32.mrf.mxu0 }
 0x1e9   :  { %1726 = vst [vmem:[#allocation2 + $0x60] sm:$0xff] %v1618_v55   ;;  %v533_v60 = vpop.f32.mrf.mxu1  ;;  %v365_v63 = vadd.f32 %v364_v57, %v1955_v58 }
 0x1ea   :  { %v981_v61 = vpop.f32.mrf.mxu2  ;;  %v534_v0 = vadd.f32 %v533_v60, %v1958_v59 }
 0x1eb   :  { %v1150_v62 = vpop.f32.mrf.mxu3  ;;  %1437 = vmatmul.msk.bf16.gmra.mxu0 %vm148_vm0, %v116_v56  ;;  %v982_v2 = vadd.f32 %v2072_v27, %v981_v61  ;;  %v671_v7 = vmax.f32 %v365_v63, 0.0 }
 0x1ec   :  { %1469 = vmatmul.msk.bf16.gmra.mxu1 %vm148_vm0, %v116_v56  ;;  %v672_v11 = vmax.f32 %v534_v0, 0.0 }
 0x1ed   :  { %v1151_v15 = vadd.f32 %v1150_v62, %v982_v2 }
 0x1f0   :  { %v366_v1 = vpop.f32.mrf.mxu0 }
 0x1f1   :  { %v367_v3 = vadd.f32 %v366_v1, %v1955_v58  ;;  %v535_v4 = vpop.f32.mrf.mxu1 }
 0x1f2   :  { %v536_v5 = vadd.f32 %v535_v4, %v1958_v59  ;;  %v983_v6 = vpop.f32.mrf.mxu2 }
 0x1f3   :  { %v673_v8 = vmax.f32 %v367_v3, 0.0  ;;  %v984_v9 = vadd.f32 %v2072_v27, %v983_v6  ;;  %v1152_v10 = vpop.f32.mrf.mxu3 }
 0x1f4   :  { %v674_v12 = vmax.f32 %v536_v5, 0.0 }
 0x1f5   :  { %v755_v16 = vpack.c.bf16 %v673_v8, %v671_v7  ;;  %v1153_v17 = vadd.f32 %v1152_v10, %v984_v9 }
 0x1f6   :  { %v756_v18 = vpack.c.bf16 %v674_v12, %v672_v11 }
 0x1f7   :  { %v1623_v19 = vpack.c.bf16 %v1153_v17, %v1151_v15  ;;  %1025 = vmatmul.bf16.gmra.mxu2 %v755_v16 }
 0x1f8   :  { %1194 = vmatmul.bf16.gmra.mxu3 %v756_v18  ;;  %v369_v21 = vpop.f32.mrf.mxu0 }
 0x1f9   :  { %1727 = vst [vmem:[#allocation2 + $0x68] sm:$0xff] %v1623_v19   ;;  %v538_v22 = vpop.f32.mrf.mxu1  ;;  %v370_v25 = vadd.f32 %v369_v21, %v1955_v58 }
 0x1fa   :  { %v986_v23 = vpop.f32.mrf.mxu2  ;;  %v539_v26 = vadd.f32 %v538_v22, %v1958_v59 }
 0x1fb   :  { %v1155_v24 = vpop.f32.mrf.mxu3  ;;  %1438 = vmatmul.msk.bf16.gmra.mxu0 %vm148_vm0, %v117_v20  ;;  %v987_v29 = vadd.f32 %v2072_v27, %v986_v23  ;;  %v675_v34 = vmax.f32 %v370_v25, 0.0 }
 0x1fc   :  { %1470 = vmatmul.msk.bf16.gmra.mxu1 %vm148_vm0, %v117_v20  ;;  %v676_v38 = vmax.f32 %v539_v26, 0.0 }
 0x1fd   :  { %v1156_v40 = vadd.f32 %v1155_v24, %v987_v29 }
 0x200   :  { %v371_v28 = vpop.f32.mrf.mxu0 }
 0x201   :  { %v372_v30 = vadd.f32 %v371_v28, %v1955_v58  ;;  %v540_v31 = vpop.f32.mrf.mxu1 }
 0x202   :  { %v541_v32 = vadd.f32 %v540_v31, %v1958_v59  ;;  %v988_v33 = vpop.f32.mrf.mxu2 }
 0x203   :  { %v677_v35 = vmax.f32 %v372_v30, 0.0  ;;  %v989_v36 = vadd.f32 %v2072_v27, %v988_v33  ;;  %v1157_v37 = vpop.f32.mrf.mxu3 }
 0x204   :  { %v678_v39 = vmax.f32 %v541_v32, 0.0 }
 0x205   :  { %v757_v41 = vpack.c.bf16 %v677_v35, %v675_v34  ;;  %v1158_v42 = vadd.f32 %v1157_v37, %v989_v36  ;;  %v2293_v36 = vld [vmem:[%s2354_s4] ss:$0 sm:$0xff]  ;;  %s1777_s4 = smov [#allocation2]  }
 0x206   :  { %v758_v43 = vpack.c.bf16 %v678_v39, %v676_v38  ;;  %s1377_s10 = sshll.u32 %s1777_s4, 4  ;;  %s1378_s10 = int_to_ptr.vmem [resolvable:$true] %s1377_s10 }
 0x207   :  { %v1628_v44 = vpack.c.bf16 %v1158_v42, %v1156_v40  ;;  %1030 = vmatmul.bf16.gmra.mxu2 %v757_v41 }
 0x208   :  { %1199 = vmatmul.bf16.gmra.mxu3 %v758_v43  ;;  %v374_v45 = vpop.f32.mrf.mxu0 }
 0x209   :  { %1728 = vst [vmem:[#allocation2 + $0x70] sm:$0xff] %v1628_v44   ;;  %v543_v46 = vpop.f32.mrf.mxu1  ;;  %v375_v49 = vadd.f32 %v374_v45, %v1955_v58 }
 0x20a   :  { %v991_v47 = vpop.f32.mrf.mxu2  ;;  %v544_v50 = vadd.f32 %v543_v46, %v1958_v59 }
 0x20b   :  { %v1160_v48 = vpop.f32.mrf.mxu3  ;;  %v992_v52 = vadd.f32 %v2072_v27, %v991_v47  ;;  %v679_v57 = vmax.f32 %v375_v49, 0.0 }
 0x20c   :  { %v680_v63 = vmax.f32 %v544_v50, 0.0 }
 0x20d   :  { %v1161_v1 = vadd.f32 %v1160_v48, %v992_v52 }
 0x210   :  { %v376_v51 = vpop.f32.mrf.mxu0 }
 0x211   :  { %v377_v53 = vadd.f32 %v376_v51, %v1955_v58  ;;  %v545_v54 = vpop.f32.mrf.mxu1 }
 0x212   :  { %v546_v55 = vadd.f32 %v545_v54, %v1958_v59  ;;  %v993_v56 = vpop.f32.mrf.mxu2 }
 0x213   :  { %v681_v60 = vmax.f32 %v377_v53, 0.0  ;;  %v994_v61 = vadd.f32 %v2072_v27, %v993_v56  ;;  %v1162_v62 = vpop.f32.mrf.mxu3 }
 0x214   :  { %v682_v0 = vmax.f32 %v546_v55, 0.0 }
 0x215   :  { %v759_v2 = vpack.c.bf16 %v681_v60, %v679_v57  ;;  %v1163_v3 = vadd.f32 %v1162_v62, %v994_v61 }
 0x216   :  { %v760_v4 = vpack.c.bf16 %v682_v0, %v680_v63 }
 0x217   :  { %v1633_v5 = vpack.c.bf16 %v1163_v3, %v1161_v1  ;;  %1035 = vmatmul.bf16.gmra.mxu2 %v759_v2 }
 0x218   :  { %1204 = vmatmul.bf16.gmra.mxu3 %v760_v4  ;;  %v379_v6 = vpop.f32.mrf.mxu0 }
 0x219   :  { %1729 = vst [vmem:[#allocation2 + $0x78] sm:$0xff] %v1633_v5   ;;  %v548_v7 = vpop.f32.mrf.mxu1  ;;  %v380_v10 = vadd.f32 %v379_v6, %v1955_v58 }
 0x21a   :  { %v996_v8 = vpop.f32.mrf.mxu2  ;;  %v549_v11 = vadd.f32 %v548_v7, %v1958_v59 }
 0x21b   :  { %v1165_v9 = vpop.f32.mrf.mxu3  ;;  %v997_v13 = vadd.f32 %v2072_v27, %v996_v8  ;;  %v683_v18 = vmax.f32 %v380_v10, 0.0 }
 0x21c   :  { %v684_v22 = vmax.f32 %v549_v11, 0.0 }
 0x21d   :  { %v1166_v24 = vadd.f32 %v1165_v9, %v997_v13 }
 0x220   :  { %v381_v12 = vpop.f32.mrf.mxu0 }
 0x221   :  { %v382_v14 = vadd.f32 %v381_v12, %v1955_v58  ;;  %v550_v15 = vpop.f32.mrf.mxu1 }
 0x222   :  { %v551_v16 = vadd.f32 %v550_v15, %v1958_v59  ;;  %v998_v17 = vpop.f32.mrf.mxu2 }
 0x223   :  { %v685_v19 = vmax.f32 %v382_v14, 0.0  ;;  %v999_v20 = vadd.f32 %v2072_v27, %v998_v17  ;;  %v1167_v21 = vpop.f32.mrf.mxu3 }
 0x224   :  { %v686_v23 = vmax.f32 %v551_v16, 0.0 }
 0x225   :  { %v761_v25 = vpack.c.bf16 %v685_v19, %v683_v18  ;;  %v1168_v26 = vadd.f32 %v1167_v21, %v999_v20 }
 0x226   :  { %v762_v28 = vpack.c.bf16 %v686_v23, %v684_v22 }
 0x227   :  { %v1638_v29 = vpack.c.bf16 %v1168_v26, %v1166_v24  ;;  %1040 = vmatmul.bf16.gmra.mxu2 %v761_v25 }
 0x228   :  { %1209 = vmatmul.bf16.gmra.mxu3 %v762_v28  ;;  %v384_v30 = vpop.f32.mrf.mxu0 }
 0x229   :  { %1730 = vst [vmem:[#allocation2 + $0x80] sm:$0xff] %v1638_v29   ;;  %v553_v31 = vpop.f32.mrf.mxu1  ;;  %v385_v34 = vadd.f32 %v384_v30, %v1955_v58 }
 0x22a   :  { %v1001_v32 = vpop.f32.mrf.mxu2  ;;  %v554_v35 = vadd.f32 %v553_v31, %v1958_v59 }
 0x22b   :  { %v1170_v33 = vpop.f32.mrf.mxu3  ;;  %v1002_v37 = vadd.f32 %v2293_v36, %v1001_v32  ;;  %v687_v42 = vmax.f32 %v385_v34, 0.0 }
 0x22c   :  { %v688_v46 = vmax.f32 %v554_v35, 0.0 }
 0x22d   :  { %v1171_v48 = vadd.f32 %v1170_v33, %v1002_v37 }
 0x230   :  { %v386_v27 = vpop.f32.mrf.mxu0 }
 0x231   :  { %v387_v38 = vadd.f32 %v386_v27, %v1955_v58  ;;  %v555_v39 = vpop.f32.mrf.mxu1 }
 0x232   :  { %v556_v40 = vadd.f32 %v555_v39, %v1958_v59  ;;  %v1003_v41 = vpop.f32.mrf.mxu2 }
 0x233   :  { %v689_v43 = vmax.f32 %v387_v38, 0.0  ;;  %v1004_v44 = vadd.f32 %v2293_v36, %v1003_v41  ;;  %v1172_v45 = vpop.f32.mrf.mxu3 }
 0x234   :  { %v690_v47 = vmax.f32 %v556_v40, 0.0 }
 0x235   :  { %v763_v49 = vpack.c.bf16 %v689_v43, %v687_v42  ;;  %v1173_v50 = vadd.f32 %v1172_v45, %v1004_v44 }
 0x236   :  { %v764_v51 = vpack.c.bf16 %v690_v47, %v688_v46 }
 0x237   :  { %v1643_v52 = vpack.c.bf16 %v1173_v50, %v1171_v48  ;;  %1045 = vmatmul.bf16.gmra.mxu2 %v763_v49 }
 0x238   :  { %1214 = vmatmul.bf16.gmra.mxu3 %v764_v51  ;;  %v389_v53 = vpop.f32.mrf.mxu0 }
 0x239   :  { %1731 = vst [vmem:[#allocation2 + $0x88] sm:$0xff] %v1643_v52   ;;  %v558_v54 = vpop.f32.mrf.mxu1  ;;  %v390_v57 = vadd.f32 %v389_v53, %v1955_v58 }
 0x23a   :  { %v1006_v55 = vpop.f32.mrf.mxu2  ;;  %v559_v60 = vadd.f32 %v558_v54, %v1958_v59 }
 0x23b   :  { %v1175_v56 = vpop.f32.mrf.mxu3  ;;  %v1007_v62 = vadd.f32 %v2293_v36, %v1006_v55  ;;  %v691_v3 = vmax.f32 %v390_v57, 0.0 }
 0x23c   :  { %v692_v7 = vmax.f32 %v559_v60, 0.0 }
 0x23d   :  { %v1176_v9 = vadd.f32 %v1175_v56, %v1007_v62 }
 0x240   :  { %v391_v61 = vpop.f32.mrf.mxu0 }
 0x241   :  { %v392_v63 = vadd.f32 %v391_v61, %v1955_v58  ;;  %v560_v0 = vpop.f32.mrf.mxu1 }
 0x242   :  { %v561_v1 = vadd.f32 %v560_v0, %v1958_v59  ;;  %v1008_v2 = vpop.f32.mrf.mxu2 }
 0x243   :  { %v693_v4 = vmax.f32 %v392_v63, 0.0  ;;  %v1009_v5 = vadd.f32 %v2293_v36, %v1008_v2  ;;  %v1177_v6 = vpop.f32.mrf.mxu3 }
 0x244   :  { %v694_v8 = vmax.f32 %v561_v1, 0.0 }
 0x245   :  { %v765_v10 = vpack.c.bf16 %v693_v4, %v691_v3  ;;  %v1178_v11 = vadd.f32 %v1177_v6, %v1009_v5 }
 0x246   :  { %v766_v12 = vpack.c.bf16 %v694_v8, %v692_v7 }
 0x247   :  { %v1648_v13 = vpack.c.bf16 %v1178_v11, %v1176_v9  ;;  %1050 = vmatmul.bf16.gmra.mxu2 %v765_v10 }
 0x248   :  { %1219 = vmatmul.bf16.gmra.mxu3 %v766_v12  ;;  %v394_v14 = vpop.f32.mrf.mxu0 }
 0x249   :  { %1732 = vst [vmem:[#allocation2 + $0x90] sm:$0xff] %v1648_v13   ;;  %v563_v15 = vpop.f32.mrf.mxu1  ;;  %v395_v18 = vadd.f32 %v394_v14, %v1955_v58 }
 0x24a   :  { %v1011_v16 = vpop.f32.mrf.mxu2  ;;  %v564_v19 = vadd.f32 %v563_v15, %v1958_v59 }
 0x24b   :  { %v1180_v17 = vpop.f32.mrf.mxu3  ;;  %v1012_v21 = vadd.f32 %v2293_v36, %v1011_v16  ;;  %v695_v26 = vmax.f32 %v395_v18, 0.0 }
 0x24c   :  { %v696_v31 = vmax.f32 %v564_v19, 0.0 }
 0x24d   :  { %v1181_v33 = vadd.f32 %v1180_v17, %v1012_v21 }
 0x250   :  { %v396_v20 = vpop.f32.mrf.mxu0 }
 0x251   :  { %v397_v22 = vadd.f32 %v396_v20, %v1955_v58  ;;  %v565_v23 = vpop.f32.mrf.mxu1 }
 0x252   :  { %v566_v24 = vadd.f32 %v565_v23, %v1958_v59  ;;  %v1013_v25 = vpop.f32.mrf.mxu2 }
 0x253   :  { %v697_v28 = vmax.f32 %v397_v22, 0.0  ;;  %v1014_v29 = vadd.f32 %v2293_v36, %v1013_v25  ;;  %v1182_v30 = vpop.f32.mrf.mxu3 }
 0x254   :  { %v698_v32 = vmax.f32 %v566_v24, 0.0 }
 0x255   :  { %v767_v34 = vpack.c.bf16 %v697_v28, %v695_v26  ;;  %v1183_v35 = vadd.f32 %v1182_v30, %v1014_v29 }
 0x256   :  { %v768_v27 = vpack.c.bf16 %v698_v32, %v696_v31 }
 0x257   :  { %v1653_v37 = vpack.c.bf16 %v1183_v35, %v1181_v33  ;;  %1055 = vmatmul.bf16.gmra.mxu2 %v767_v34 }
 0x258   :  { %1224 = vmatmul.bf16.gmra.mxu3 %v768_v27  ;;  %v399_v38 = vpop.f32.mrf.mxu0 }
 0x259   :  { %1733 = vst [vmem:[#allocation2 + $0x98] sm:$0xff] %v1653_v37   ;;  %v568_v39 = vpop.f32.mrf.mxu1  ;;  %v400_v42 = vadd.f32 %v399_v38, %v1955_v58 }
 0x25a   :  { %v1016_v40 = vpop.f32.mrf.mxu2  ;;  %v569_v43 = vadd.f32 %v568_v39, %v1958_v59 }
 0x25b   :  { %v1185_v41 = vpop.f32.mrf.mxu3  ;;  %v1017_v45 = vadd.f32 %v2293_v36, %v1016_v40  ;;  %v699_v50 = vmax.f32 %v400_v42, 0.0 }
 0x25c   :  { %v700_v54 = vmax.f32 %v569_v43, 0.0 }
 0x25d   :  { %v1186_v56 = vadd.f32 %v1185_v41, %v1017_v45 }
 0x260   :  { %v401_v44 = vpop.f32.mrf.mxu0 }
 0x261   :  { %v402_v46 = vadd.f32 %v401_v44, %v1955_v58  ;;  %v570_v47 = vpop.f32.mrf.mxu1 }
 0x262   :  { %v571_v48 = vadd.f32 %v570_v47, %v1958_v59  ;;  %v1018_v49 = vpop.f32.mrf.mxu2 }
 0x263   :  { %v701_v51 = vmax.f32 %v402_v46, 0.0  ;;  %v1019_v52 = vadd.f32 %v2293_v36, %v1018_v49  ;;  %v1187_v53 = vpop.f32.mrf.mxu3 }
 0x264   :  { %v702_v55 = vmax.f32 %v571_v48, 0.0 }
 0x265   :  { %v769_v57 = vpack.c.bf16 %v701_v51, %v699_v50  ;;  %v1188_v60 = vadd.f32 %v1187_v53, %v1019_v52 }
 0x266   :  { %v770_v61 = vpack.c.bf16 %v702_v55, %v700_v54 }
 0x267   :  { %v1658_v62 = vpack.c.bf16 %v1188_v60, %v1186_v56  ;;  %1060 = vmatmul.bf16.gmra.mxu2 %v769_v57 }
 0x268   :  { %1229 = vmatmul.bf16.gmra.mxu3 %v770_v61  ;;  %v404_v63 = vpop.f32.mrf.mxu0 }
 0x269   :  { %1734 = vst [vmem:[#allocation2 + $0xa0] sm:$0xff] %v1658_v62   ;;  %v573_v0 = vpop.f32.mrf.mxu1  ;;  %v405_v3 = vadd.f32 %v404_v63, %v1955_v58 }
 0x26a   :  { %v1021_v1 = vpop.f32.mrf.mxu2  ;;  %v574_v4 = vadd.f32 %v573_v0, %v1958_v59 }
 0x26b   :  { %v1190_v2 = vpop.f32.mrf.mxu3  ;;  %v1022_v6 = vadd.f32 %v2293_v36, %v1021_v1  ;;  %v703_v11 = vmax.f32 %v405_v3, 0.0 }
 0x26c   :  { %v704_v15 = vmax.f32 %v574_v4, 0.0 }
 0x26d   :  { %v1191_v17 = vadd.f32 %v1190_v2, %v1022_v6 }
 0x270   :  { %v406_v5 = vpop.f32.mrf.mxu0 }
 0x271   :  { %v407_v7 = vadd.f32 %v406_v5, %v1955_v58  ;;  %v575_v8 = vpop.f32.mrf.mxu1 }
 0x272   :  { %v576_v9 = vadd.f32 %v575_v8, %v1958_v59  ;;  %v1023_v10 = vpop.f32.mrf.mxu2 }
 0x273   :  { %v705_v12 = vmax.f32 %v407_v7, 0.0  ;;  %v1024_v13 = vadd.f32 %v2293_v36, %v1023_v10  ;;  %v1192_v14 = vpop.f32.mrf.mxu3 }
 0x274   :  { %v706_v16 = vmax.f32 %v576_v9, 0.0 }
 0x275   :  { %v771_v18 = vpack.c.bf16 %v705_v12, %v703_v11  ;;  %v1193_v19 = vadd.f32 %v1192_v14, %v1024_v13 }
 0x276   :  { %v772_v20 = vpack.c.bf16 %v706_v16, %v704_v15 }
 0x277   :  { %v1663_v21 = vpack.c.bf16 %v1193_v19, %v1191_v17  ;;  %1065 = vmatmul.bf16.gmra.mxu2 %v771_v18 }
 0x278   :  { %1234 = vmatmul.bf16.gmra.mxu3 %v772_v20  ;;  %v409_v22 = vpop.f32.mrf.mxu0 }
 0x279   :  { %1735 = vst [vmem:[#allocation2 + $0xa8] sm:$0xff] %v1663_v21   ;;  %v578_v23 = vpop.f32.mrf.mxu1  ;;  %v410_v26 = vadd.f32 %v409_v22, %v1955_v58 }
 0x27a   :  { %v1026_v24 = vpop.f32.mrf.mxu2  ;;  %v579_v28 = vadd.f32 %v578_v23, %v1958_v59 }
 0x27b   :  { %v1195_v25 = vpop.f32.mrf.mxu3  ;;  %v1027_v30 = vadd.f32 %v2293_v36, %v1026_v24  ;;  %v707_v35 = vmax.f32 %v410_v26, 0.0 }
 0x27c   :  { %v708_v39 = vmax.f32 %v579_v28, 0.0 }
 0x27d   :  { %v1196_v41 = vadd.f32 %v1195_v25, %v1027_v30 }
 0x280   :  { %v411_v29 = vpop.f32.mrf.mxu0 }
 0x281   :  { %v412_v31 = vadd.f32 %v411_v29, %v1955_v58  ;;  %v580_v32 = vpop.f32.mrf.mxu1 }
 0x282   :  { %v581_v33 = vadd.f32 %v580_v32, %v1958_v59  ;;  %v1028_v34 = vpop.f32.mrf.mxu2 }
 0x283   :  { %v709_v27 = vmax.f32 %v412_v31, 0.0  ;;  %v1029_v37 = vadd.f32 %v2293_v36, %v1028_v34  ;;  %v1197_v38 = vpop.f32.mrf.mxu3 }
 0x284   :  { %v710_v40 = vmax.f32 %v581_v33, 0.0 }
 0x285   :  { %v773_v42 = vpack.c.bf16 %v709_v27, %v707_v35  ;;  %v1198_v43 = vadd.f32 %v1197_v38, %v1029_v37 }
 0x286   :  { %v774_v44 = vpack.c.bf16 %v710_v40, %v708_v39 }
 0x287   :  { %v1668_v45 = vpack.c.bf16 %v1198_v43, %v1196_v41  ;;  %1070 = vmatmul.bf16.gmra.mxu2 %v773_v42 }
 0x288   :  { %1239 = vmatmul.bf16.gmra.mxu3 %v774_v44 }
 0x289   :  { %1736 = vst [vmem:[#allocation2 + $0xb0] sm:$0xff] %v1668_v45  }
 0x28a   :  { %v1031_v58 = vpop.f32.mrf.mxu2 }
 0x28b   :  { %v1200_v46 = vpop.f32.mrf.mxu3  ;;  %v1032_v59 = vadd.f32 %v2293_v36, %v1031_v58 }
 0x28d   :  { %v1201_v50 = vadd.f32 %v1200_v46, %v1032_v59 }
 0x292   :  { %v1033_v47 = vpop.f32.mrf.mxu2 }
 0x293   :  { %v1034_v48 = vadd.f32 %v2293_v36, %v1033_v47  ;;  %v1202_v49 = vpop.f32.mrf.mxu3 }
 0x295   :  { %v1203_v51 = vadd.f32 %v1202_v49, %v1034_v48 }
 0x297   :  { %v1673_v52 = vpack.c.bf16 %v1203_v51, %v1201_v50 }
 0x299   :  { %1737 = vst [vmem:[#allocation2 + $0xb8] sm:$0xff] %v1673_v52  }
 0x29a   :  { %v1036_v53 = vpop.f32.mrf.mxu2 }
 0x29b   :  { %v1205_v54 = vpop.f32.mrf.mxu3  ;;  %v1037_v55 = vadd.f32 %v2293_v36, %v1036_v53 }
 0x29d   :  { %v1206_v61 = vadd.f32 %v1205_v54, %v1037_v55 }
 0x2a2   :  { %v1038_v56 = vpop.f32.mrf.mxu2 }
 0x2a3   :  { %v1039_v57 = vadd.f32 %v2293_v36, %v1038_v56  ;;  %v1207_v60 = vpop.f32.mrf.mxu3 }
 0x2a5   :  { %v1208_v62 = vadd.f32 %v1207_v60, %v1039_v57 }
 0x2a7   :  { %v1678_v63 = vpack.c.bf16 %v1208_v62, %v1206_v61 }
 0x2a9   :  { %1738 = vst [vmem:[#allocation2 + $0xc0] sm:$0xff] %v1678_v63  }
 0x2aa   :  { %v1041_v0 = vpop.f32.mrf.mxu2 }
 0x2ab   :  { %v1210_v1 = vpop.f32.mrf.mxu3  ;;  %v1042_v2 = vadd.f32 %v2293_v36, %v1041_v0 }
 0x2ad   :  { %v1211_v6 = vadd.f32 %v1210_v1, %v1042_v2 }
 0x2b2   :  { %v1043_v3 = vpop.f32.mrf.mxu2 }
 0x2b3   :  { %v1044_v4 = vadd.f32 %v2293_v36, %v1043_v3  ;;  %v1212_v5 = vpop.f32.mrf.mxu3 }
 0x2b5   :  { %v1213_v7 = vadd.f32 %v1212_v5, %v1044_v4 }
 0x2b7   :  { %v1683_v8 = vpack.c.bf16 %v1213_v7, %v1211_v6 }
 0x2b9   :  { %1739 = vst [vmem:[#allocation2 + $0xc8] sm:$0xff] %v1683_v8  }
 0x2ba   :  { %v1046_v9 = vpop.f32.mrf.mxu2 }
 0x2bb   :  { %v1215_v10 = vpop.f32.mrf.mxu3  ;;  %v1047_v11 = vadd.f32 %v2293_v36, %v1046_v9 }
 0x2bd   :  { %v1216_v15 = vadd.f32 %v1215_v10, %v1047_v11 }
 0x2c2   :  { %v1048_v12 = vpop.f32.mrf.mxu2 }
 0x2c3   :  { %v1049_v13 = vadd.f32 %v2293_v36, %v1048_v12  ;;  %v1217_v14 = vpop.f32.mrf.mxu3 }
 0x2c5   :  { %v1218_v16 = vadd.f32 %v1217_v14, %v1049_v13 }
 0x2c7   :  { %v1688_v17 = vpack.c.bf16 %v1218_v16, %v1216_v15 }
 0x2c9   :  { %1740 = vst [vmem:[#allocation2 + $0xd0] sm:$0xff] %v1688_v17  }
 0x2ca   :  { %v1051_v18 = vpop.f32.mrf.mxu2 }
 0x2cb   :  { %v1220_v19 = vpop.f32.mrf.mxu3  ;;  %v1052_v20 = vadd.f32 %v2293_v36, %v1051_v18 }
 0x2cd   :  { %v1221_v24 = vadd.f32 %v1220_v19, %v1052_v20 }
 0x2d2   :  { %v1053_v21 = vpop.f32.mrf.mxu2 }
 0x2d3   :  { %v1054_v22 = vadd.f32 %v2293_v36, %v1053_v21  ;;  %v1222_v23 = vpop.f32.mrf.mxu3 }
 0x2d5   :  { %v1223_v25 = vadd.f32 %v1222_v23, %v1054_v22 }
 0x2d7   :  { %v1693_v26 = vpack.c.bf16 %v1223_v25, %v1221_v24 }
 0x2d9   :  { %1741 = vst [vmem:[#allocation2 + $0xd8] sm:$0xff] %v1693_v26  }
 0x2da   :  { %v1056_v28 = vpop.f32.mrf.mxu2 }
 0x2db   :  { %v1225_v29 = vpop.f32.mrf.mxu3  ;;  %v1057_v30 = vadd.f32 %v2293_v36, %v1056_v28 }
 0x2dd   :  { %v1226_v34 = vadd.f32 %v1225_v29, %v1057_v30 }
 0x2e2   :  { %v1058_v31 = vpop.f32.mrf.mxu2 }
 0x2e3   :  { %v1059_v32 = vadd.f32 %v2293_v36, %v1058_v31  ;;  %v1227_v33 = vpop.f32.mrf.mxu3 }
 0x2e5   :  { %v1228_v35 = vadd.f32 %v1227_v33, %v1059_v32 }
 0x2e7   :  { %v1698_v27 = vpack.c.bf16 %v1228_v35, %v1226_v34 }
 0x2e9   :  { %1742 = vst [vmem:[#allocation2 + $0xe0] sm:$0xff] %v1698_v27  }
 0x2ea   :  { %v1061_v37 = vpop.f32.mrf.mxu2 }
 0x2eb   :  { %v1230_v38 = vpop.f32.mrf.mxu3  ;;  %v1062_v39 = vadd.f32 %v2293_v36, %v1061_v37 }
 0x2ed   :  { %v1231_v43 = vadd.f32 %v1230_v38, %v1062_v39 }
 0x2f2   :  { %v1063_v40 = vpop.f32.mrf.mxu2 }
 0x2f3   :  { %v1064_v41 = vadd.f32 %v2293_v36, %v1063_v40  ;;  %v1232_v42 = vpop.f32.mrf.mxu3 }
 0x2f5   :  { %v1233_v44 = vadd.f32 %v1232_v42, %v1064_v41 }
 0x2f7   :  { %v1703_v45 = vpack.c.bf16 %v1233_v44, %v1231_v43 }
 0x2f9   :  { %1743 = vst [vmem:[#allocation2 + $0xe8] sm:$0xff] %v1703_v45  }
 0x2fa   :  { %v1066_v58 = vpop.f32.mrf.mxu2 }
 0x2fb   :  { %v1235_v46 = vpop.f32.mrf.mxu3  ;;  %v1067_v59 = vadd.f32 %v2293_v36, %v1066_v58 }
 0x2fd   :  { %v1236_v50 = vadd.f32 %v1235_v46, %v1067_v59 }
 0x302   :  { %v1068_v47 = vpop.f32.mrf.mxu2 }
 0x303   :  { %v1069_v48 = vadd.f32 %v2293_v36, %v1068_v47  ;;  %v1237_v49 = vpop.f32.mrf.mxu3 }
 0x305   :  { %v1238_v51 = vadd.f32 %v1237_v49, %v1069_v48 }
 0x307   :  { %v1708_v52 = vpack.c.bf16 %v1238_v51, %v1236_v50 }
 0x309   :  { %1744 = vst [vmem:[#allocation2 + $0xf0] sm:$0xff] %v1708_v52  }
 0x30a   :  { %v1071_v53 = vpop.f32.mrf.mxu2 }
 0x30b   :  { %v1240_v54 = vpop.f32.mrf.mxu3  ;;  %v1072_v55 = vadd.f32 %v2293_v36, %v1071_v53 }
 0x30d   :  { %v1241_v61 = vadd.f32 %v1240_v54, %v1072_v55 }
 0x312   :  { %v1073_v56 = vpop.f32.mrf.mxu2 }
 0x313   :  { %v1074_v57 = vadd.f32 %v2293_v36, %v1073_v56  ;;  %v1242_v60 = vpop.f32.mrf.mxu3 }
 0x315   :  { %v1243_v62 = vadd.f32 %v1242_v60, %v1074_v57 }
 0x317   :  { %v1713_v63 = vpack.c.bf16 %v1243_v62, %v1241_v61 }
 0x319   :  { %1745 = vst [vmem:[#allocation2 + $0xf8] sm:$0xff] %v1713_v63  }
 0x31a   :  { %1385 = dma.vmem_to_hbm [thread:$0]  %s1378_s10, 4096, %s1380_s1, [#allocation3], %s1778_s13, %s1778_s13, %s1779_s14  }
 0x31b   :  { %1775 = dma.done.wait [#allocation3], 4096  }
 0x31c   :  { %1776 = vsyncadd [#allocation3], 4294963200 }
 0x31d   :  { %1390 = vsyncpa [#allocation3], 1 }

</bundles_post_ra>
